<compile_context>
chip_gen: v6e
topology: v6e:2x2x1
jax: 0.10.0
libtpu: 0.0.40
codegen_flags: <defaults>
</compile_context>

<pallas_src>
import jax
import jax.numpy as jnp
import numpy as np
from jax.experimental import pallas as pl
from jax.experimental.pallas import tpu as pltpu


# ---------------------------------------------------------------------------
# Fused MaxPool2d(2) + (Conv3x3 + BN + ReLU) x 2 kernel  (one batch image /
# grid step; all intermediates stay in VMEM / vregs)
# ---------------------------------------------------------------------------
def _down_fused_kernel(x_ref, w1_ref, s1_ref, b1_ref, w2_ref, s2_ref, b2_ref,
                       o_ref, pad1_ref, pat1_ref, pad2_ref, pat2_ref):
    # x_ref:  (1, Ho, 2, Wo, 2*Cin)  -- 2x2 pool window exposed by a free reshape
    # w*_ref: (9*C, Cout)            -- im2col-flattened conv weights
    # s*/b*:  (1, Cout)              -- folded BN scale / (conv-bias + BN shift)
    # o_ref:  (1, Ho, Wo, Cout)
    _, Ho, Wo, Cout = o_ref.shape
    Cin = pad1_ref.shape[-1]

    # ---- MaxPool2d(2), fully in-kernel ------------------------------------
    x = x_ref[0]                                             # (Ho, 2, Wo, 2*Cin)
    hmax = jnp.maximum(x[:, 0], x[:, 1])                     # max over H-pair
    pooled = jnp.maximum(hmax[:, :, :Cin], hmax[:, :, Cin:]) # max over W-pair -> (Ho, Wo, Cin)

    def conv3x3_bn_relu(src, pad_ref, pat_ref, w_ref, s_ref, b_ref):
        # src: (Ho, Wo, C) f32 value held in vregs/VMEM
        C = src.shape[-1]
        # pad=1 halo in a zero-initialised VMEM scratch (no wrapper jnp.pad)
        pad_ref[...] = jnp.zeros_like(pad_ref)
        pad_ref[1:Ho + 1, 1:Wo + 1, :] = src.astype(pad_ref.dtype)
        xp = pad_ref[...]                                    # (Ho+2, Wo+2, C)
        # im2col patch matrix in VMEM scratch -> ONE MXU matmul (K = 9*C)
        for k in range(9):                                   # statically unrolled
            dy, dx = divmod(k, 3)
            pat_ref[:, k * C:(k + 1) * C] = (
                xp[dy:dy + Ho, dx:dx + Wo, :].reshape(Ho * Wo, C))
        acc = jnp.dot(pat_ref[...], w_ref[...],
                      preferred_element_type=jnp.float32)    # (Ho*Wo, Cout) f32
        # folded (conv-bias + BatchNorm) affine + ReLU, in f32
        return jnp.maximum(acc * s_ref[...] + b_ref[...], 0.0)

    y1 = conv3x3_bn_relu(pooled, pad1_ref, pat1_ref, w1_ref, s1_ref, b1_ref)
    y2 = conv3x3_bn_relu(y1.reshape(Ho, Wo, Cout), pad2_ref, pat2_ref,
                         w2_ref, s2_ref, b2_ref)
    o_ref[0] = y2.reshape(Ho, Wo, Cout).astype(o_ref.dtype)


@jax.jit
def down_forward(x_nchw, params):
    """Pallas implementation of `down.forward` (NCHW in / NCHW out)."""
    (w1, s1, b1), (w2, s2, b2) = params
    N, Cin, H, W = x_nchw.shape
    Cout = w1.shape[-1]
    Ho, Wo = H // 2, W // 2

    # im2col-flattened weights / (1, Cout) affine rows (tiny, folded by XLA)
    w1f = w1.reshape(9 * Cin, Cout).astype(jnp.float32)
    w2f = w2.reshape(9 * Cout, Cout).astype(jnp.float32)
    s1r, b1r = s1.reshape(1, Cout), b1.reshape(1, Cout)
    s2r, b2r = s2.reshape(1, Cout), b2.reshape(1, Cout)

    # NCHW -> NHWC at the module boundary, then a FREE contiguous reshape that
    # exposes the 2x2 pooling window (no transpose/pad glue, no extra HBM pass).
    x = jnp.transpose(x_nchw, (0, 2, 3, 1))
    xw = x.reshape(N, Ho, 2, Wo, 2 * Cin)

    out_nhwc = pl.pallas_call(
        _down_fused_kernel,
        out_shape=jax.ShapeDtypeStruct((N, Ho, Wo, Cout), x.dtype),
        grid=(N,),
        in_specs=[
            pl.BlockSpec((1, Ho, 2, Wo, 2 * Cin), lambda n: (n, 0, 0, 0, 0)),
            pl.BlockSpec((9 * Cin, Cout), lambda n: (0, 0)),
            pl.BlockSpec((1, Cout), lambda n: (0, 0)),
            pl.BlockSpec((1, Cout), lambda n: (0, 0)),
            pl.BlockSpec((9 * Cout, Cout), lambda n: (0, 0)),
            pl.BlockSpec((1, Cout), lambda n: (0, 0)),
            pl.BlockSpec((1, Cout), lambda n: (0, 0)),
        ],
        out_specs=pl.BlockSpec((1, Ho, Wo, Cout), lambda n: (n, 0, 0, 0)),
        scratch_shapes=[
            pltpu.VMEM((Ho + 2, Wo + 2, Cin), jnp.float32),   # padded pooled act
            pltpu.VMEM((Ho * Wo, 9 * Cin), jnp.float32),      # im2col patches #1
            pltpu.VMEM((Ho + 2, Wo + 2, Cout), jnp.float32),  # padded conv1 out
            pltpu.VMEM((Ho * Wo, 9 * Cout), jnp.float32),     # im2col patches #2
        ],
        compiler_params=pltpu.CompilerParams(
            dimension_semantics=("parallel",)),
    )(xw, w1f, s1r, b1r, w2f, s2r, b2r)
    return jnp.transpose(out_nhwc, (0, 3, 1, 2))   # NHWC -> NCHW (module boundary)


# ---------------------------------------------------------------------------
# Parameter init (deterministic): conv weights in HWIO + folded BN affine
# ---------------------------------------------------------------------------
def init_down_params(key, in_ch, out_ch):
    ks = jax.random.split(key, 8)

    def conv_bn(kw, kb, kg, kbe, cin, cout):
        w = jax.random.normal(kw, (cout, cin, 3, 3), jnp.float32) / np.sqrt(cin * 9)
        b = 0.05 * jax.random.normal(kb, (cout,), jnp.float32)          # conv bias
        gamma = 1.0 + 0.1 * jax.random.normal(kg, (cout,), jnp.float32)
        beta = 0.1 * jax.random.normal(kbe, (cout,), jnp.float32)
        running_mean = jnp.zeros((cout,), jnp.float32)                  # fresh BN stats
        running_var = jnp.ones((cout,), jnp.float32)
        eps = 1e-5
        scale = gamma / jnp.sqrt(running_var + eps)                     # fold BN
        bias = (b - running_mean) * scale + beta                        # fold conv bias + BN
        w_hwio = jnp.transpose(w, (2, 3, 1, 0))                         # OIHW -> HWIO
        return w_hwio, scale, bias

    p1 = conv_bn(ks[0], ks[1], ks[2], ks[3], in_ch, out_ch)
    p2 = conv_bn(ks[4], ks[5], ks[6], ks[7], out_ch, out_ch)
    return p1, p2


# ---------------------------------------------------------------------------
# Pure-JAX reference for correctness check
# ---------------------------------------------------------------------------
def ref_forward(x_nchw, params):
    (w1, s1, b1), (w2, s2, b2) = params
    x = jnp.transpose(x_nchw, (0, 2, 3, 1))
    N, H, W, C = x.shape
    x = x.reshape(N, H // 2, 2, W // 2, 2, C).max(axis=(2, 4))

    def conv(x, w, s, b):
        y = jax.lax.conv_general_dilated(
            x, w, window_strides=(1, 1), padding="SAME",
            dimension_numbers=("NHWC", "HWIO", "NHWC"))
        return jnp.maximum(y * s + b, 0.0)

    x = conv(x, w1, s1, b1)
    x = conv(x, w2, s2, b2)
    return jnp.transpose(x, (0, 3, 1, 2))


if __name__ == "__main__":
    in_ch, out_ch = 4, 8
    N, H, W = 2, 16, 16

    root = jax.random.PRNGKey(0)
    kx, kp = jax.random.split(root)
    x = jax.random.normal(kx, (N, in_ch, H, W), jnp.float32)
    params = init_down_params(kp, in_ch, out_ch)

    out = jax.block_until_ready(down_forward(x, params))
    ref = jax.block_until_ready(ref_forward(x, params))

    assert out.shape == (N, out_ch, H // 2, W // 2), out.shape
    np.testing.assert_allclose(np.asarray(out), np.asarray(ref),
                               rtol=2e-4, atol=2e-4)
    print("KERNEL_OK")
</pallas_src>

<mosaic_0001>
module attributes {stable_mosaic.version = 11 : i64} {
  func.func @_down_fused_kernel(%arg0: i32, %arg1: memref<1x8x2x8x8xf32, #tpu.memory_space<vmem>>, %arg2: memref<36x8xf32, #tpu.memory_space<vmem>>, %arg3: memref<1x8xf32, #tpu.memory_space<vmem>>, %arg4: memref<1x8xf32, #tpu.memory_space<vmem>>, %arg5: memref<72x8xf32, #tpu.memory_space<vmem>>, %arg6: memref<1x8xf32, #tpu.memory_space<vmem>>, %arg7: memref<1x8xf32, #tpu.memory_space<vmem>>, %arg8: memref<1x8x8x8xf32, #tpu.memory_space<vmem>>, %arg9: memref<10x10x4xf32, #tpu.memory_space<vmem>>, %arg10: memref<64x36xf32, #tpu.memory_space<vmem>>, %arg11: memref<10x10x8xf32, #tpu.memory_space<vmem>>, %arg12: memref<64x72xf32, #tpu.memory_space<vmem>>) attributes {dimension_semantics = [#tpu.dimension_semantics<parallel>], iteration_bounds = array<i64: 2>, scalar_prefetch = 0 : i64, scratch_operands = 4 : i64, tpu.core_type = #tpu.core_type<tc>, window_params = [{transform_indices = @transform_0, window_bounds = array<i64: 1, 8, 2, 8, 8>}, {pipeline_mode = #tpu.pipeline_mode<synchronous>, transform_indices = @transform_1, window_bounds = array<i64: 36, 8>}, {pipeline_mode = #tpu.pipeline_mode<synchronous>, transform_indices = @transform_2, window_bounds = array<i64: 1, 8>}, {pipeline_mode = #tpu.pipeline_mode<synchronous>, transform_indices = @transform_3, window_bounds = array<i64: 1, 8>}, {pipeline_mode = #tpu.pipeline_mode<synchronous>, transform_indices = @transform_4, window_bounds = array<i64: 72, 8>}, {pipeline_mode = #tpu.pipeline_mode<synchronous>, transform_indices = @transform_5, window_bounds = array<i64: 1, 8>}, {pipeline_mode = #tpu.pipeline_mode<synchronous>, transform_indices = @transform_6, window_bounds = array<i64: 1, 8>}, {transform_indices = @transform_7, window_bounds = array<i64: 1, 8, 8, 8>}]} {
    %c0 = arith.constant 0 : index
    %c0_0 = arith.constant 0 : index
    %c0_1 = arith.constant 0 : index
    %c0_2 = arith.constant 0 : index
    %c0_3 = arith.constant 0 : index
    %0 = vector.load %arg1[%c0, %c0_0, %c0_1, %c0_2, %c0_3] : memref<1x8x2x8x8xf32, #tpu.memory_space<vmem>>, vector<1x8x2x8x8xf32>
    %1 = vector.shape_cast %0 : vector<1x8x2x8x8xf32> to vector<8x2x8x8xf32>
    %2 = vector.extract_strided_slice %1 {offsets = [0, 0, 0, 0], sizes = [8, 1, 8, 8], strides = [1, 1, 1, 1]} : vector<8x2x8x8xf32> to vector<8x1x8x8xf32>
    %3 = vector.shape_cast %2 : vector<8x1x8x8xf32> to vector<8x8x8xf32>
    %4 = vector.extract_strided_slice %1 {offsets = [0, 1, 0, 0], sizes = [8, 1, 8, 8], strides = [1, 1, 1, 1]} : vector<8x2x8x8xf32> to vector<8x1x8x8xf32>
    %5 = vector.shape_cast %4 : vector<8x1x8x8xf32> to vector<8x8x8xf32>
    %6 = arith.maximumf %3, %5 : vector<8x8x8xf32>
    %7 = vector.extract_strided_slice %6 {offsets = [0, 0, 0], sizes = [8, 8, 4], strides = [1, 1, 1]} : vector<8x8x8xf32> to vector<8x8x4xf32>
    %8 = vector.extract_strided_slice %6 {offsets = [0, 0, 4], sizes = [8, 8, 4], strides = [1, 1, 1]} : vector<8x8x8xf32> to vector<8x8x4xf32>
    %9 = arith.maximumf %7, %8 : vector<8x8x4xf32>
    %cst = arith.constant 0.000000e+00 : f32
    %10 = vector.broadcast %cst : f32 to vector<10x10x4xf32>
    %c0_4 = arith.constant 0 : index
    %c0_5 = arith.constant 0 : index
    %c0_6 = arith.constant 0 : index
    %11 = vector.load %arg9[%c0_4, %c0_5, %c0_6] : memref<10x10x4xf32, #tpu.memory_space<vmem>>, vector<10x10x4xf32>
    tpu.vector_store %arg9[%c0_4, %c0_5, %c0_6], %10 {strides = array<i32>} : memref<10x10x4xf32, #tpu.memory_space<vmem>>, vector<10x10x4xf32>,
    %c1 = arith.constant 1 : index
    %c1_7 = arith.constant 1 : index
    %c0_8 = arith.constant 0 : index
    %12 = vector.load %arg9[%c1, %c1_7, %c0_8] : memref<10x10x4xf32, #tpu.memory_space<vmem>>, vector<8x8x4xf32>
    tpu.vector_store %arg9[%c1, %c1_7, %c0_8], %9 {strides = array<i32>} : memref<10x10x4xf32, #tpu.memory_space<vmem>>, vector<8x8x4xf32>,
    %c0_9 = arith.constant 0 : index
    %c0_10 = arith.constant 0 : index
    %c0_11 = arith.constant 0 : index
    %13 = vector.load %arg9[%c0_9, %c0_10, %c0_11] : memref<10x10x4xf32, #tpu.memory_space<vmem>>, vector<10x10x4xf32>
    %14 = vector.extract_strided_slice %13 {offsets = [0, 0, 0], sizes = [8, 8, 4], strides = [1, 1, 1]} : vector<10x10x4xf32> to vector<8x8x4xf32>
    %15 = vector.shape_cast %14 : vector<8x8x4xf32> to vector<64x4xf32>
    %c0_12 = arith.constant 0 : index
    %c0_13 = arith.constant 0 : index
    %16 = vector.load %arg10[%c0_12, %c0_13] : memref<64x36xf32, #tpu.memory_space<vmem>>, vector<64x4xf32>
    tpu.vector_store %arg10[%c0_12, %c0_13], %15 {strides = array<i32>} : memref<64x36xf32, #tpu.memory_space<vmem>>, vector<64x4xf32>,
    %17 = vector.extract_strided_slice %13 {offsets = [0, 1, 0], sizes = [8, 8, 4], strides = [1, 1, 1]} : vector<10x10x4xf32> to vector<8x8x4xf32>
    %18 = vector.shape_cast %17 : vector<8x8x4xf32> to vector<64x4xf32>
    %c0_14 = arith.constant 0 : index
    %c4 = arith.constant 4 : index
    %19 = vector.load %arg10[%c0_14, %c4] : memref<64x36xf32, #tpu.memory_space<vmem>>, vector<64x4xf32>
    tpu.vector_store %arg10[%c0_14, %c4], %18 {strides = array<i32>} : memref<64x36xf32, #tpu.memory_space<vmem>>, vector<64x4xf32>,
    %20 = vector.extract_strided_slice %13 {offsets = [0, 2, 0], sizes = [8, 8, 4], strides = [1, 1, 1]} : vector<10x10x4xf32> to vector<8x8x4xf32>
    %21 = vector.shape_cast %20 : vector<8x8x4xf32> to vector<64x4xf32>
    %c0_15 = arith.constant 0 : index
    %c8 = arith.constant 8 : index
    %22 = vector.load %arg10[%c0_15, %c8] : memref<64x36xf32, #tpu.memory_space<vmem>>, vector<64x4xf32>
    tpu.vector_store %arg10[%c0_15, %c8], %21 {strides = array<i32>} : memref<64x36xf32, #tpu.memory_space<vmem>>, vector<64x4xf32>,
    %23 = vector.extract_strided_slice %13 {offsets = [1, 0, 0], sizes = [8, 8, 4], strides = [1, 1, 1]} : vector<10x10x4xf32> to vector<8x8x4xf32>
    %24 = vector.shape_cast %23 : vector<8x8x4xf32> to vector<64x4xf32>
    %c0_16 = arith.constant 0 : index
    %c12 = arith.constant 12 : index
    %25 = vector.load %arg10[%c0_16, %c12] : memref<64x36xf32, #tpu.memory_space<vmem>>, vector<64x4xf32>
    tpu.vector_store %arg10[%c0_16, %c12], %24 {strides = array<i32>} : memref<64x36xf32, #tpu.memory_space<vmem>>, vector<64x4xf32>,
    %26 = vector.extract_strided_slice %13 {offsets = [1, 1, 0], sizes = [8, 8, 4], strides = [1, 1, 1]} : vector<10x10x4xf32> to vector<8x8x4xf32>
    %27 = vector.shape_cast %26 : vector<8x8x4xf32> to vector<64x4xf32>
    %c0_17 = arith.constant 0 : index
    %c16 = arith.constant 16 : index
    %28 = vector.load %arg10[%c0_17, %c16] : memref<64x36xf32, #tpu.memory_space<vmem>>, vector<64x4xf32>
    tpu.vector_store %arg10[%c0_17, %c16], %27 {strides = array<i32>} : memref<64x36xf32, #tpu.memory_space<vmem>>, vector<64x4xf32>,
    %29 = vector.extract_strided_slice %13 {offsets = [1, 2, 0], sizes = [8, 8, 4], strides = [1, 1, 1]} : vector<10x10x4xf32> to vector<8x8x4xf32>
    %30 = vector.shape_cast %29 : vector<8x8x4xf32> to vector<64x4xf32>
    %c0_18 = arith.constant 0 : index
    %c20 = arith.constant 20 : index
    %31 = vector.load %arg10[%c0_18, %c20] : memref<64x36xf32, #tpu.memory_space<vmem>>, vector<64x4xf32>
    tpu.vector_store %arg10[%c0_18, %c20], %30 {strides = array<i32>} : memref<64x36xf32, #tpu.memory_space<vmem>>, vector<64x4xf32>,
    %32 = vector.extract_strided_slice %13 {offsets = [2, 0, 0], sizes = [8, 8, 4], strides = [1, 1, 1]} : vector<10x10x4xf32> to vector<8x8x4xf32>
    %33 = vector.shape_cast %32 : vector<8x8x4xf32> to vector<64x4xf32>
    %c0_19 = arith.constant 0 : index
    %c24 = arith.constant 24 : index
    %34 = vector.load %arg10[%c0_19, %c24] : memref<64x36xf32, #tpu.memory_space<vmem>>, vector<64x4xf32>
    tpu.vector_store %arg10[%c0_19, %c24], %33 {strides = array<i32>} : memref<64x36xf32, #tpu.memory_space<vmem>>, vector<64x4xf32>,
    %35 = vector.extract_strided_slice %13 {offsets = [2, 1, 0], sizes = [8, 8, 4], strides = [1, 1, 1]} : vector<10x10x4xf32> to vector<8x8x4xf32>
    %36 = vector.shape_cast %35 : vector<8x8x4xf32> to vector<64x4xf32>
    %c0_20 = arith.constant 0 : index
    %c28 = arith.constant 28 : index
    %37 = vector.load %arg10[%c0_20, %c28] : memref<64x36xf32, #tpu.memory_space<vmem>>, vector<64x4xf32>
    tpu.vector_store %arg10[%c0_20, %c28], %36 {strides = array<i32>} : memref<64x36xf32, #tpu.memory_space<vmem>>, vector<64x4xf32>,
    %38 = vector.extract_strided_slice %13 {offsets = [2, 2, 0], sizes = [8, 8, 4], strides = [1, 1, 1]} : vector<10x10x4xf32> to vector<8x8x4xf32>
    %39 = vector.shape_cast %38 : vector<8x8x4xf32> to vector<64x4xf32>
    %c0_21 = arith.constant 0 : index
    %c32 = arith.constant 32 : index
    %40 = vector.load %arg10[%c0_21, %c32] : memref<64x36xf32, #tpu.memory_space<vmem>>, vector<64x4xf32>
    tpu.vector_store %arg10[%c0_21, %c32], %39 {strides = array<i32>} : memref<64x36xf32, #tpu.memory_space<vmem>>, vector<64x4xf32>,
    %c0_22 = arith.constant 0 : index
    %c0_23 = arith.constant 0 : index
    %41 = vector.load %arg10[%c0_22, %c0_23] : memref<64x36xf32, #tpu.memory_space<vmem>>, vector<64x36xf32>
    %c0_24 = arith.constant 0 : index
    %c0_25 = arith.constant 0 : index
    %42 = vector.load %arg2[%c0_24, %c0_25] : memref<36x8xf32, #tpu.memory_space<vmem>>, vector<36x8xf32>
    %cst_26 = arith.constant dense<0.000000e+00> : vector<64x8xf32>
    %43 = tpu.matmul %41, %42, %cst_26 {dimension_numbers = #tpu.dot_dimension_numbers<[1], [0], [0], [1], [0, 0, 1, 1], [], []>} : vector<64x36xf32>, vector<36x8xf32>, vector<64x8xf32> -> vector<64x8xf32>
    %c0_27 = arith.constant 0 : index
    %c0_28 = arith.constant 0 : index
    %44 = vector.load %arg3[%c0_27, %c0_28] : memref<1x8xf32, #tpu.memory_space<vmem>>, vector<1x8xf32>
    %45 = vector.broadcast %44 : vector<1x8xf32> to vector<64x8xf32>
    %46 = arith.mulf %43, %45 : vector<64x8xf32>
    %c0_29 = arith.constant 0 : index
    %c0_30 = arith.constant 0 : index
    %47 = vector.load %arg4[%c0_29, %c0_30] : memref<1x8xf32, #tpu.memory_space<vmem>>, vector<1x8xf32>
    %48 = vector.broadcast %47 : vector<1x8xf32> to vector<64x8xf32>
    %49 = arith.addf %46, %48 : vector<64x8xf32>
    %cst_31 = arith.constant 0.000000e+00 : f32
    %50 = vector.broadcast %cst_31 : f32 to vector<64x8xf32>
    %51 = arith.maximumf %49, %50 : vector<64x8xf32>
    %52 = vector.shape_cast %51 : vector<64x8xf32> to vector<8x8x8xf32>
    %cst_32 = arith.constant 0.000000e+00 : f32
    %53 = vector.broadcast %cst_32 : f32 to vector<10x10x8xf32>
    %c0_33 = arith.constant 0 : index
    %c0_34 = arith.constant 0 : index
    %c0_35 = arith.constant 0 : index
    %54 = vector.load %arg11[%c0_33, %c0_34, %c0_35] : memref<10x10x8xf32, #tpu.memory_space<vmem>>, vector<10x10x8xf32>
    tpu.vector_store %arg11[%c0_33, %c0_34, %c0_35], %53 {strides = array<i32>} : memref<10x10x8xf32, #tpu.memory_space<vmem>>, vector<10x10x8xf32>,
    %c1_36 = arith.constant 1 : index
    %c1_37 = arith.constant 1 : index
    %c0_38 = arith.constant 0 : index
    %55 = vector.load %arg11[%c1_36, %c1_37, %c0_38] : memref<10x10x8xf32, #tpu.memory_space<vmem>>, vector<8x8x8xf32>
    tpu.vector_store %arg11[%c1_36, %c1_37, %c0_38], %52 {strides = array<i32>} : memref<10x10x8xf32, #tpu.memory_space<vmem>>, vector<8x8x8xf32>,
    %c0_39 = arith.constant 0 : index
    %c0_40 = arith.constant 0 : index
    %c0_41 = arith.constant 0 : index
    %56 = vector.load %arg11[%c0_39, %c0_40, %c0_41] : memref<10x10x8xf32, #tpu.memory_space<vmem>>, vector<10x10x8xf32>
    %57 = vector.extract_strided_slice %56 {offsets = [0, 0, 0], sizes = [8, 8, 8], strides = [1, 1, 1]} : vector<10x10x8xf32> to vector<8x8x8xf32>
    %58 = vector.shape_cast %57 : vector<8x8x8xf32> to vector<64x8xf32>
    %c0_42 = arith.constant 0 : index
    %c0_43 = arith.constant 0 : index
    %59 = vector.load %arg12[%c0_42, %c0_43] : memref<64x72xf32, #tpu.memory_space<vmem>>, vector<64x8xf32>
    tpu.vector_store %arg12[%c0_42, %c0_43], %58 {strides = array<i32>} : memref<64x72xf32, #tpu.memory_space<vmem>>, vector<64x8xf32>,
    %60 = vector.extract_strided_slice %56 {offsets = [0, 1, 0], sizes = [8, 8, 8], strides = [1, 1, 1]} : vector<10x10x8xf32> to vector<8x8x8xf32>
    %61 = vector.shape_cast %60 : vector<8x8x8xf32> to vector<64x8xf32>
    %c0_44 = arith.constant 0 : index
    %c8_45 = arith.constant 8 : index
    %62 = vector.load %arg12[%c0_44, %c8_45] : memref<64x72xf32, #tpu.memory_space<vmem>>, vector<64x8xf32>
    tpu.vector_store %arg12[%c0_44, %c8_45], %61 {strides = array<i32>} : memref<64x72xf32, #tpu.memory_space<vmem>>, vector<64x8xf32>,
    %63 = vector.extract_strided_slice %56 {offsets = [0, 2, 0], sizes = [8, 8, 8], strides = [1, 1, 1]} : vector<10x10x8xf32> to vector<8x8x8xf32>
    %64 = vector.shape_cast %63 : vector<8x8x8xf32> to vector<64x8xf32>
    %c0_46 = arith.constant 0 : index
    %c16_47 = arith.constant 16 : index
    %65 = vector.load %arg12[%c0_46, %c16_47] : memref<64x72xf32, #tpu.memory_space<vmem>>, vector<64x8xf32>
    tpu.vector_store %arg12[%c0_46, %c16_47], %64 {strides = array<i32>} : memref<64x72xf32, #tpu.memory_space<vmem>>, vector<64x8xf32>,
    %66 = vector.extract_strided_slice %56 {offsets = [1, 0, 0], sizes = [8, 8, 8], strides = [1, 1, 1]} : vector<10x10x8xf32> to vector<8x8x8xf32>
    %67 = vector.shape_cast %66 : vector<8x8x8xf32> to vector<64x8xf32>
    %c0_48 = arith.constant 0 : index
    %c24_49 = arith.constant 24 : index
    %68 = vector.load %arg12[%c0_48, %c24_49] : memref<64x72xf32, #tpu.memory_space<vmem>>, vector<64x8xf32>
    tpu.vector_store %arg12[%c0_48, %c24_49], %67 {strides = array<i32>} : memref<64x72xf32, #tpu.memory_space<vmem>>, vector<64x8xf32>,
    %69 = vector.extract_strided_slice %56 {offsets = [1, 1, 0], sizes = [8, 8, 8], strides = [1, 1, 1]} : vector<10x10x8xf32> to vector<8x8x8xf32>
    %70 = vector.shape_cast %69 : vector<8x8x8xf32> to vector<64x8xf32>
    %c0_50 = arith.constant 0 : index
    %c32_51 = arith.constant 32 : index
    %71 = vector.load %arg12[%c0_50, %c32_51] : memref<64x72xf32, #tpu.memory_space<vmem>>, vector<64x8xf32>
    tpu.vector_store %arg12[%c0_50, %c32_51], %70 {strides = array<i32>} : memref<64x72xf32, #tpu.memory_space<vmem>>, vector<64x8xf32>,
    %72 = vector.extract_strided_slice %56 {offsets = [1, 2, 0], sizes = [8, 8, 8], strides = [1, 1, 1]} : vector<10x10x8xf32> to vector<8x8x8xf32>
    %73 = vector.shape_cast %72 : vector<8x8x8xf32> to vector<64x8xf32>
    %c0_52 = arith.constant 0 : index
    %c40 = arith.constant 40 : index
    %74 = vector.load %arg12[%c0_52, %c40] : memref<64x72xf32, #tpu.memory_space<vmem>>, vector<64x8xf32>
    tpu.vector_store %arg12[%c0_52, %c40], %73 {strides = array<i32>} : memref<64x72xf32, #tpu.memory_space<vmem>>, vector<64x8xf32>,
    %75 = vector.extract_strided_slice %56 {offsets = [2, 0, 0], sizes = [8, 8, 8], strides = [1, 1, 1]} : vector<10x10x8xf32> to vector<8x8x8xf32>
    %76 = vector.shape_cast %75 : vector<8x8x8xf32> to vector<64x8xf32>
    %c0_53 = arith.constant 0 : index
    %c48 = arith.constant 48 : index
    %77 = vector.load %arg12[%c0_53, %c48] : memref<64x72xf32, #tpu.memory_space<vmem>>, vector<64x8xf32>
    tpu.vector_store %arg12[%c0_53, %c48], %76 {strides = array<i32>} : memref<64x72xf32, #tpu.memory_space<vmem>>, vector<64x8xf32>,
    %78 = vector.extract_strided_slice %56 {offsets = [2, 1, 0], sizes = [8, 8, 8], strides = [1, 1, 1]} : vector<10x10x8xf32> to vector<8x8x8xf32>
    %79 = vector.shape_cast %78 : vector<8x8x8xf32> to vector<64x8xf32>
    %c0_54 = arith.constant 0 : index
    %c56 = arith.constant 56 : index
    %80 = vector.load %arg12[%c0_54, %c56] : memref<64x72xf32, #tpu.memory_space<vmem>>, vector<64x8xf32>
    tpu.vector_store %arg12[%c0_54, %c56], %79 {strides = array<i32>} : memref<64x72xf32, #tpu.memory_space<vmem>>, vector<64x8xf32>,
    %81 = vector.extract_strided_slice %56 {offsets = [2, 2, 0], sizes = [8, 8, 8], strides = [1, 1, 1]} : vector<10x10x8xf32> to vector<8x8x8xf32>
    %82 = vector.shape_cast %81 : vector<8x8x8xf32> to vector<64x8xf32>
    %c0_55 = arith.constant 0 : index
    %c64 = arith.constant 64 : index
    %83 = vector.load %arg12[%c0_55, %c64] : memref<64x72xf32, #tpu.memory_space<vmem>>, vector<64x8xf32>
    tpu.vector_store %arg12[%c0_55, %c64], %82 {strides = array<i32>} : memref<64x72xf32, #tpu.memory_space<vmem>>, vector<64x8xf32>,
    %c0_56 = arith.constant 0 : index
    %c0_57 = arith.constant 0 : index
    %84 = vector.load %arg12[%c0_56, %c0_57] : memref<64x72xf32, #tpu.memory_space<vmem>>, vector<64x72xf32>
    %c0_58 = arith.constant 0 : index
    %c0_59 = arith.constant 0 : index
    %85 = vector.load %arg5[%c0_58, %c0_59] : memref<72x8xf32, #tpu.memory_space<vmem>>, vector<72x8xf32>
    %cst_60 = arith.constant dense<0.000000e+00> : vector<64x8xf32>
    %86 = tpu.matmul %84, %85, %cst_60 {dimension_numbers = #tpu.dot_dimension_numbers<[1], [0], [0], [1], [0, 0, 1, 1], [], []>} : vector<64x72xf32>, vector<72x8xf32>, vector<64x8xf32> -> vector<64x8xf32>
    %c0_61 = arith.constant 0 : index
    %c0_62 = arith.constant 0 : index
    %87 = vector.load %arg6[%c0_61, %c0_62] : memref<1x8xf32, #tpu.memory_space<vmem>>, vector<1x8xf32>
    %88 = vector.broadcast %87 : vector<1x8xf32> to vector<64x8xf32>
    %89 = arith.mulf %86, %88 : vector<64x8xf32>
    %c0_63 = arith.constant 0 : index
    %c0_64 = arith.constant 0 : index
    %90 = vector.load %arg7[%c0_63, %c0_64] : memref<1x8xf32, #tpu.memory_space<vmem>>, vector<1x8xf32>
    %91 = vector.broadcast %90 : vector<1x8xf32> to vector<64x8xf32>
    %92 = arith.addf %89, %91 : vector<64x8xf32>
    %cst_65 = arith.constant 0.000000e+00 : f32
    %93 = vector.broadcast %cst_65 : f32 to vector<64x8xf32>
    %94 = arith.maximumf %92, %93 : vector<64x8xf32>
    %95 = vector.shape_cast %94 : vector<64x8xf32> to vector<8x8x8xf32>
    %c0_66 = arith.constant 0 : index
    %c0_67 = arith.constant 0 : index
    %c0_68 = arith.constant 0 : index
    %c0_69 = arith.constant 0 : index
    %96 = vector.load %arg8[%c0_66, %c0_67, %c0_68, %c0_69] : memref<1x8x8x8xf32, #tpu.memory_space<vmem>>, vector<1x8x8x8xf32>
    %97 = vector.shape_cast %96 : vector<1x8x8x8xf32> to vector<8x8x8xf32>
    %98 = vector.shape_cast %95 : vector<8x8x8xf32> to vector<1x8x8x8xf32>
    tpu.vector_store %arg8[%c0_66, %c0_67, %c0_68, %c0_69], %98 {strides = array<i32>} : memref<1x8x8x8xf32, #tpu.memory_space<vmem>>, vector<1x8x8x8xf32>,
    return
  }
  func.func @transform_0(%arg0: i32) -> (i32, i32, i32, i32, i32) {
    %c0_i32 = arith.constant 0 : i32
    %c0_i32_0 = arith.constant 0 : i32
    %c0_i32_1 = arith.constant 0 : i32
    %c0_i32_2 = arith.constant 0 : i32
    %c0_i32_3 = arith.constant 0 : i32
    return %arg0, %c0_i32, %c0_i32_0, %c0_i32_1, %c0_i32_2 : i32, i32, i32, i32, i32
  }
  func.func @transform_1(%arg0: i32) -> (i32, i32) {
    %c0_i32 = arith.constant 0 : i32
    %c0_i32_0 = arith.constant 0 : i32
    %c0_i32_1 = arith.constant 0 : i32
    return %c0_i32, %c0_i32_0 : i32, i32
  }
  func.func @transform_2(%arg0: i32) -> (i32, i32) {
    %c0_i32 = arith.constant 0 : i32
    %c0_i32_0 = arith.constant 0 : i32
    %c0_i32_1 = arith.constant 0 : i32
    return %c0_i32, %c0_i32_0 : i32, i32
  }
  func.func @transform_3(%arg0: i32) -> (i32, i32) {
    %c0_i32 = arith.constant 0 : i32
    %c0_i32_0 = arith.constant 0 : i32
    %c0_i32_1 = arith.constant 0 : i32
    return %c0_i32, %c0_i32_0 : i32, i32
  }
  func.func @transform_4(%arg0: i32) -> (i32, i32) {
    %c0_i32 = arith.constant 0 : i32
    %c0_i32_0 = arith.constant 0 : i32
    %c0_i32_1 = arith.constant 0 : i32
    return %c0_i32, %c0_i32_0 : i32, i32
  }
  func.func @transform_5(%arg0: i32) -> (i32, i32) {
    %c0_i32 = arith.constant 0 : i32
    %c0_i32_0 = arith.constant 0 : i32
    %c0_i32_1 = arith.constant 0 : i32
    return %c0_i32, %c0_i32_0 : i32, i32
  }
  func.func @transform_6(%arg0: i32) -> (i32, i32) {
    %c0_i32 = arith.constant 0 : i32
    %c0_i32_0 = arith.constant 0 : i32
    %c0_i32_1 = arith.constant 0 : i32
    return %c0_i32, %c0_i32_0 : i32, i32
  }
  func.func @transform_7(%arg0: i32) -> (i32, i32, i32, i32) {
    %c0_i32 = arith.constant 0 : i32
    %c0_i32_0 = arith.constant 0 : i32
    %c0_i32_1 = arith.constant 0 : i32
    %c0_i32_2 = arith.constant 0 : i32
    return %arg0, %c0_i32, %c0_i32_0, %c0_i32_1 : i32, i32, i32, i32
  }
}

</mosaic_0001>

<bundles_post_ra>
// kernel: down_forward.1
= control target key start
LH: loop header
LB: loop body
LE: loop exit
PB: predicated region body
PF: predicated region fallthrough
CT: control target
= control target key end

     0   :  { %s1784_s24 = smov 0   ;;  %s2450_s0 = inlined_call_operand.vmem [shape: f32[2,8,2,8,8], index: 0, kind: input, shape index: {}]   ;;  %s2451_s1 = inlined_call_operand.vmem [shape: f32[36,8], index: 1, kind: input, shape index: {}]   ;;  %s2452_s2 = inlined_call_operand.vmem [shape: f32[1,8], index: 2, kind: input, shape index: {}]   ;;  %s2453_s3 = inlined_call_operand.vmem [shape: f32[1,8], index: 3, kind: input, shape index: {}]   ;;  %s2454_s4 = inlined_call_operand.vmem [shape: f32[72,8], index: 4, kind: input, shape index: {}]   ;;  %s2455_s5 = inlined_call_operand.vmem [shape: f32[1,8], index: 5, kind: input, shape index: {}]   ;;  %s2456_s6 = inlined_call_operand.vmem [shape: f32[1,8], index: 6, kind: input, shape index: {}]   ;;  %s2457_s7 = inlined_call_operand.vmem [shape: f32[2,8,8,8], index: 7, kind: output, shape index: {}]  }
   0x1 LB: > { %s1584_s25 = sadd.s32 4294967295, %s1728_s24   ;;  %p1588_p0 = scmp.ge.s32.totalorder %s1728_s24, 1  ;;  %s1728_s24 = sphi %s1784_s24, %s17_s24  }
   0x2   : > { %p237_p1 = scmp.lt.s32.totalorder %s1728_s24, 3 }
   0x4   : > { %p238_p2 = pnand %p1588_p0, %p237_p1 }
   0x5   : > { %p1792_p3 = scmp.lt.s32.totalorder (!%p238_p2), %s1584_s25, 1  ;;  %s1731_s8 = smov (!%p238_p2), 124  }
   0x6   : > { %241 = sbr.rel (%p238_p2) target bundleno = 994 (0x3e2), region = 48  ;;  %s1732_s9 = smov (!%p238_p2), 4  }
   0x7   : > { %s1733_s10 = smov (!%p238_p2), 24   ;;  %s1734_s11 = smov (!%p238_p2), 8  }
   0x8   : > { %s1735_s12 = smov (!%p238_p2), 28   ;;  %s1736_s13 = smov (!%p238_p2), 12  }
   0x9   : > { %s1737_s14 = smov (!%p238_p2), 16   ;;  %s1738_s15 = smov (!%p238_p2), 20  }
   0xa   : > { %s1739_s26 = smov (!%p238_p2), 32   ;;  %s1740_s29 = smov (!%p238_p2), 48  }
   0xb   : > { %vm343_vm0 = vcmask 31744   ;;  %vm345_vm1 = vcmask 25600   ;;  %v1730_v0 = vmov 0.0   ;;  %s2460_s25 = smov (!%p1792_p3, %s1584_s25), 1  ;;  %vm418_vm2 = vcmask 1046528   ;;  %s1743_s16 = smov 64  }
   0xc   : > { %347 = vst.msk [vmem:[#allocation2 + $0x10] sm:$0xff] %vm343_vm0, %v1730_v0  ;;  %344 = vst.msk [vmem:[#allocation2] sm:$0xff] %vm343_vm0, %v1730_v0  ;;  %s1616_s27 = sshll.u32 %s2460_s25, 7  ;;  %vm476_vm3 = vcmask 1045504   ;;  %vm467_vm4 = vcmask 64544   ;;  %vm525_vm5 = vcmask 97344  }
   0xd   : > { %348 = vst.msk [vmem:[#allocation2 + $0x18] sm:$0x3] %vm345_vm1, %v1730_v0  ;;  %346 = vst.msk [vmem:[#allocation2 + $0x8] sm:$0x3] %vm345_vm1, %v1730_v0  ;;  %s273_s30 = scalar_lea.vmem %s2450_s0, %s1616_s27  ;;  %vm786_vm6 = vcmask 1043456   ;;  %vm559_vm7 = vcmask 130144  }
   0xe   : > { %349 = vst.msk [vmem:[#allocation2 + $0x20] sm:$0xff] %vm343_vm0, %v1730_v0  ;;  %351 = vst.msk [vmem:[#allocation2 + $0x30] sm:$0xff] %vm343_vm0, %v1730_v0  ;;  %v279_v1 = vld [vmem:[%s273_s30] sm:$0xff]  ;;  %v280_v2 = vld [vmem:[%s273_s30 + $0x8] sm:$0xff]  ;;  %vm596_vm8 = vcmask 162944   ;;  %vm632_vm9 = vcmask 195744  }
   0xf   : > { %350 = vst.msk [vmem:[#allocation2 + $0x28] sm:$0x3] %vm345_vm1, %v1730_v0  ;;  %352 = vst.msk [vmem:[#allocation2 + $0x38] sm:$0x3] %vm345_vm1, %v1730_v0  ;;  %v283_v3 = vld [vmem:[%s273_s30 + $0x20] sm:$0xff]  ;;  %v295_v4 = vmax.f32 %v279_v1, %v280_v2  ;;  %v284_v5 = vld [vmem:[%s273_s30 + $0x28] sm:$0xff] }
  0x10   : > { %353 = vst.msk [vmem:[#allocation2 + $0x40] sm:$0xff] %vm343_vm0, %v1730_v0  ;;  %355 = vst.msk [vmem:[#allocation2 + $0x50] sm:$0xff] %vm343_vm0, %v1730_v0  ;;  %v281_v6 = vld [vmem:[%s273_s30 + $0x10] sm:$0xff]  ;;  %v282_v7 = vld [vmem:[%s273_s30 + $0x18] sm:$0xff]  ;;  %v297_v8 = vmax.f32 %v283_v3, %v284_v5  ;;  %vm666_vm10 = vcmask 228544   ;;  %vm703_vm11 = vcmask 261344  }
  0x11   : > { %354 = vst.msk [vmem:[#allocation2 + $0x48] sm:$0x3] %vm345_vm1, %v1730_v0  ;;  %356 = vst.msk [vmem:[#allocation2 + $0x58] sm:$0x3] %vm345_vm1, %v1730_v0  ;;  %v285_v9 = vld [vmem:[%s273_s30 + $0x30] sm:$0xff]  ;;  %v286_v10 = vld [vmem:[%s273_s30 + $0x38] sm:$0xff]  ;;  %311 = vrot.lane.b32.xlu0 %v295_v4, %s1731_s8  ;;  %v296_v11 = vmax.f32 %v281_v6, %v282_v7 }
  0x12   : > { %357 = vst.msk [vmem:[#allocation2 + $0x60] sm:$0xff] %vm343_vm0, %v1730_v0  ;;  %359 = vst.msk [vmem:[#allocation2 + $0x70] sm:$0xff] %vm343_vm0, %v1730_v0  ;;  %315 = vrot.lane.b32.xlu1 %v297_v8, %s1731_s8  ;;  %v298_v12 = vmax.f32 %v285_v9, %v286_v10  ;;  %v287_v13 = vld [vmem:[%s273_s30 + $0x40] sm:$0xff]  ;;  %v288_v14 = vld [vmem:[%s273_s30 + $0x48] sm:$0xff]  ;;  %vm739_vm12 = vcmask 294144   ;;  %vm761_vm13 = vcmask 293888  }
  0x13   : > { %358 = vst.msk [vmem:[#allocation2 + $0x68] sm:$0x3] %vm345_vm1, %v1730_v0  ;;  %360 = vst.msk [vmem:[#allocation2 + $0x78] sm:$0x3] %vm345_vm1, %v1730_v0  ;;  %v289_v15 = vld [vmem:[%s273_s30 + $0x50] sm:$0xff]  ;;  %v290_v16 = vld [vmem:[%s273_s30 + $0x58] sm:$0xff]  ;;  %v299_v18 = vmax.f32 %v287_v13, %v288_v14 }
  0x14   : > { %361 = vst.msk [vmem:[#allocation2 + $0x80] sm:$0xff] %vm343_vm0, %v1730_v0  ;;  %363 = vst.msk [vmem:[#allocation2 + $0x90] sm:$0xff] %vm343_vm0, %v1730_v0  ;;  %v374_v17 = vld [vmem:[#allocation2] sm:$0xff]  ;;  %v300_v19 = vmax.f32 %v289_v15, %v290_v16  ;;  %v292_v21 = vld [vmem:[%s273_s30 + $0x68] sm:$0xff]  ;;  %vm933_vm14 = vcmask 64512   ;;  %vm935_vm15 = vcmask 58368  }
  0x15   : > { %362 = vst.msk [vmem:[#allocation2 + $0x88] sm:$0x3] %vm345_vm1, %v1730_v0  ;;  %364 = vst.msk [vmem:[#allocation2 + $0x98] sm:$0x3] %vm345_vm1, %v1730_v0  ;;  %313 = vrot.lane.b32.xlu0 %v296_v11, %s1731_s8  ;;  %v291_v20 = vld [vmem:[%s273_s30 + $0x60] sm:$0xff]  ;;  %v293_v22 = vld [vmem:[%s273_s30 + $0x70] sm:$0xff] }
  0x16   : > { %394 = vst.msk [vmem:[#allocation3] sm:$0xff] %vm343_vm0, %v374_v17  ;;  %317 = vrot.lane.b32.xlu1 %v298_v12, %s1731_s8  ;;  %v294_v23 = vld [vmem:[%s273_s30 + $0x78] sm:$0xff]  ;;  %v375_v24 = vld [vmem:[#allocation2 + $0x8] sm:$0x3]  ;;  %v301_v25 = vmax.f32 %v291_v20, %v292_v21  ;;  %v419_v27 = vrot.slane %v374_v17, 1  ;;  %v477_v32 = vrot.slane %v374_v17, 2 }
  0x17   : > { %v302_v26 = vmax.f32 %v293_v22, %v294_v23  ;;  %v420_v28 = vrot.slane %v375_v24, 1  ;;  %v478_v33 = vrot.slane %v375_v24, 2  ;;  %939 = vst.msk [vmem:[#allocation4 + $0x20] sm:$0xff] %vm933_vm14, %v1730_v0  ;;  %934 = vst.msk [vmem:[#allocation4] sm:$0xff] %vm933_vm14, %v1730_v0  ;;  %s1741_s30 = smov 56   ;;  %vm1113_vm1 = vcmask 195712  }
  0x18   : > { %940 = vst.msk [vmem:[#allocation4 + $0x28] sm:$0x3] %vm935_vm15, %v1730_v0  ;;  %936 = vst.msk [vmem:[#allocation4 + $0x8] sm:$0x3] %vm935_vm15, %v1730_v0 }
  0x19   : > { %319 = vrot.lane.b32.xlu0 %v299_v18, %s1731_s8  ;;  %v421_v31 = vsel %vm418_vm2, %v419_v27, %v420_v28  ;;  %v479_v36 = vsel %vm476_vm3, %v477_v32, %v478_v33  ;;  %v759_v27 = vld [vmem:[%s2451_s1 + $0x18] sm:$0xff]  ;;  %937 = vst.msk [vmem:[#allocation4 + $0x10] sm:$0xff] %vm933_vm14, %v1730_v0  ;;  %941 = vst.msk [vmem:[#allocation4 + $0x30] sm:$0xff] %vm933_vm14, %v1730_v0 }
  0x1a   : > { %321 = vrot.lane.b32.xlu1 %v300_v19, %s1731_s8  ;;  %938 = vst.msk [vmem:[#allocation4 + $0x18] sm:$0x3] %vm935_vm15, %v1730_v0  ;;  %942 = vst.msk [vmem:[#allocation4 + $0x38] sm:$0x3] %vm935_vm15, %v1730_v0 }
  0x1b   : > { %v1845_v29 = vld [vmem:[#allocation2 + $0x90] sm:$0xff]  ;;  %943 = vst.msk [vmem:[#allocation4 + $0x40] sm:$0xff] %vm933_vm14, %v1730_v0  ;;  %945 = vst.msk [vmem:[#allocation4 + $0x50] sm:$0xff] %vm933_vm14, %v1730_v0 }
  0x1c   : > { %v1847_v30 = vld [vmem:[#allocation2 + $0x98] sm:$0x3]  ;;  %v676_v34 = vrot.slane %v1845_v29, 1  ;;  %944 = vst.msk [vmem:[#allocation4 + $0x48] sm:$0x3] %vm935_vm15, %v1730_v0 }
  0x1d   : > { %323 = vrot.lane.b32.xlu0 %v301_v25, %s1731_s8  ;;  %v677_v35 = vrot.slane %v1847_v30, 1  ;;  %946 = vst.msk [vmem:[#allocation4 + $0x58] sm:$0x3] %vm935_vm15, %v1730_v0  ;;  %948 = vst.msk [vmem:[#allocation4 + $0x68] sm:$0x3] %vm935_vm15, %v1730_v0 }
  0x1e   : > { %325 = vrot.lane.b32.xlu1 %v302_v26, %s1731_s8  ;;  %947 = vst.msk [vmem:[#allocation4 + $0x60] sm:$0xff] %vm933_vm14, %v1730_v0  ;;  %949 = vst.msk [vmem:[#allocation4 + $0x70] sm:$0xff] %vm933_vm14, %v1730_v0 }
  0x1f   : > { %v678_v37 = vsel %vm418_vm2, %v676_v34, %v677_v35  ;;  %v757_v34 = vld [vmem:[%s2451_s1 + $0x8] sm:$0xff]  ;;  %v756_v35 = vld [vmem:[%s2451_s1] sm:$0xff]  ;;  %950 = vst.msk [vmem:[#allocation4 + $0x78] sm:$0x3] %vm935_vm15, %v1730_v0  ;;  %952 = vst.msk [vmem:[#allocation4 + $0x88] sm:$0x3] %vm935_vm15, %v1730_v0 }
  0x20   : > { %951 = vst.msk [vmem:[#allocation4 + $0x80] sm:$0xff] %vm933_vm14, %v1730_v0  ;;  %953 = vst.msk [vmem:[#allocation4 + $0x90] sm:$0xff] %vm933_vm14, %v1730_v0 }
  0x21   : > { %443 = vrot.lane.b32.xlu0 %v421_v31, %s1732_s9  ;;  %v758_v31 = vld [vmem:[%s2451_s1 + $0x10] sm:$0xff]  ;;  %954 = vst.msk [vmem:[#allocation4 + $0x98] sm:$0x3] %vm935_vm15, %v1730_v0 }
  0x22   : > { %656 = vrot.lane.b32.xlu1 %v1845_v29, %s1733_s10 }
  0x25   : > { %501 = vrot.lane.b32.xlu0 %v479_v36, %s1734_s11 }
  0x26   : > { %693 = vrot.lane.b32.xlu1 %v678_v37, %s1735_s12 }
  0x83   : > { %v312_v38 = vpop.permute.xlu0 %311 }
  0x84   : > { %v335_v39 = vmax.f32 %v295_v4, %v312_v38  ;;  %v316_v40 = vpop.permute.xlu1 %315 }
  0x85   : > { %v337_v41 = vmax.f32 %v297_v8, %v316_v40 }
  0x86   : > { %366 = vst.msk [vmem:[#allocation2 + $0x11] sm:$0xff] %vm343_vm0, %v335_v39 }
  0x87   : > { %368 = vst.msk [vmem:[#allocation2 + $0x31] sm:$0xff] %vm343_vm0, %v337_v41  ;;  %v314_v42 = vpop.permute.xlu0 %313 }
  0x88   : > { %v336_v43 = vmax.f32 %v296_v11, %v314_v42  ;;  %v318_v44 = vpop.permute.xlu1 %317 }
  0x89   : > { %v338_v45 = vmax.f32 %v298_v12, %v318_v44 }
  0x8a   : > { %367 = vst.msk [vmem:[#allocation2 + $0x21] sm:$0xff] %vm343_vm0, %v336_v43 }
  0x8b   : > { %369 = vst.msk [vmem:[#allocation2 + $0x41] sm:$0xff] %vm343_vm0, %v338_v45  ;;  %v320_v46 = vpop.permute.xlu0 %319 }
  0x8c   : > { %v339_v47 = vmax.f32 %v299_v18, %v320_v46  ;;  %v322_v48 = vpop.permute.xlu1 %321 }
  0x8d   : > { %v376_v49 = vld [vmem:[#allocation2 + $0x10] sm:$0xff]  ;;  %v340_v50 = vmax.f32 %v300_v19, %v322_v48  ;;  %v377_v1 = vld [vmem:[#allocation2 + $0x18] sm:$0x3] }
  0x8e   : > { %535 = vrot.lane.b32.xlu0 %v376_v49, %s1736_s13  ;;  %395 = vst.msk [vmem:[#allocation3 + $0x8] sm:$0xff] %vm343_vm0, %v376_v49  ;;  %370 = vst.msk [vmem:[#allocation2 + $0x51] sm:$0xff] %vm343_vm0, %v339_v47  ;;  %v1866_v51 = vld [vmem:[#allocation2 + $0x30] sm:$0xff]  ;;  %v422_v2 = vrot.slane %v376_v49, 1  ;;  %v423_v3 = vrot.slane %v377_v1, 1  ;;  %v480_v5 = vrot.slane %v376_v49, 2 }
  0x8f   : > { %397 = vst.msk [vmem:[#allocation3 + $0x18] sm:$0xff] %vm343_vm0, %v1866_v51  ;;  %371 = vst.msk [vmem:[#allocation2 + $0x61] sm:$0xff] %vm343_vm0, %v340_v50  ;;  %v324_v52 = vpop.permute.xlu0 %323  ;;  %v481_v9 = vrot.slane %v377_v1, 2  ;;  %v381_v10 = vld [vmem:[#allocation2 + $0x38] sm:$0x3]  ;;  %v428_v13 = vrot.slane %v1866_v51, 1 }
  0x90   : > { %v341_v53 = vmax.f32 %v301_v25, %v324_v52  ;;  %v326_v54 = vpop.permute.xlu1 %325  ;;  %v424_v6 = vsel %vm418_vm2, %v422_v2, %v423_v3  ;;  %v429_v14 = vrot.slane %v381_v10, 1  ;;  %v486_v19 = vrot.slane %v1866_v51, 2  ;;  %v760_v25 = vld [vmem:[%s2451_s1 + $0x20] sm:$0xf] }
  0x91   : > { %v378_v55 = vld [vmem:[#allocation2 + $0x20] sm:$0xff]  ;;  %v342_v56 = vmax.f32 %v302_v26, %v326_v54  ;;  %v379_v4 = vld [vmem:[#allocation2 + $0x28] sm:$0x3]  ;;  %v482_v12 = vsel %vm476_vm3, %v480_v5, %v481_v9  ;;  %v487_v20 = vrot.slane %v381_v10, 2  ;;  %1648 = vmatprep.subr.msk.mxu0 %vm786_vm6, %v760_v25  ;;  %v712_v3 = vrot.slane %v1845_v29, 2 }
  0x92   : > { %644 = vrot.lane.b32.xlu0 %v1866_v51, %s1733_s10  ;;  %537 = vrot.lane.b32.xlu1 %v378_v55, %s1736_s13  ;;  %396 = vst.msk [vmem:[#allocation3 + $0x10] sm:$0xff] %vm343_vm0, %v378_v55  ;;  %v1875_v57 = vld [vmem:[#allocation2 + $0x40] sm:$0xff]  ;;  %372 = vst.msk [vmem:[#allocation2 + $0x71] sm:$0xff] %vm343_vm0, %v341_v53  ;;  %v425_v7 = vrot.slane %v378_v55, 1  ;;  %v426_v8 = vrot.slane %v379_v4, 1  ;;  %v430_v15 = vsel %vm418_vm2, %v428_v13, %v429_v14  ;;  %v483_v16 = vrot.slane %v378_v55, 2 }
  0x93   : > { %398 = vst.msk [vmem:[#allocation3 + $0x20] sm:$0xff] %vm343_vm0, %v1875_v57  ;;  %373 = vst.msk [vmem:[#allocation2 + $0x81] sm:$0xff] %vm343_vm0, %v342_v56  ;;  %v444_v58 = vpop.permute.xlu0 %443  ;;  %v484_v17 = vrot.slane %v379_v4, 2  ;;  %v488_v21 = vsel %vm476_vm3, %v486_v19, %v487_v20  ;;  %v383_v22 = vld [vmem:[#allocation2 + $0x48] sm:$0x3]  ;;  %v431_v23 = vrot.slane %v1875_v57, 1  ;;  %1649 = vmatpush3.msk.msra.mxu0 %vm786_vm6, %v760_v25 }
  0x94   : > { %468 = vst.msk [vmem:[#allocation3] sm:$0xff] %vm467_vm4, %v444_v58  ;;  %v427_v11 = vsel %vm418_vm2, %v425_v7, %v426_v8  ;;  %v432_v24 = vrot.slane %v383_v22, 1  ;;  %1650 = vmatprep.subr.mxu0 %v759_v27  ;;  %v489_v37 = vrot.slane %v1875_v57, 2  ;;  %v490_v38 = vrot.slane %v383_v22, 2 }
  0x95   : > { %v1882_v59 = vld [vmem:[#allocation2 + $0x50] sm:$0xff]  ;;  %v485_v18 = vsel %vm476_vm3, %v483_v16, %v484_v17  ;;  %v385_v28 = vld [vmem:[#allocation2 + $0x58] sm:$0x3]  ;;  %1651 = vmatpush3.msra.mxu0 %v759_v27  ;;  %v713_v4 = vrot.slane %v1847_v30, 2  ;;  %vm1291_vm6 = vcmask 523712  }
  0x96   : > { %541 = vrot.lane.b32.xlu0 %v1875_v57, %s1736_s13  ;;  %642 = vrot.lane.b32.xlu1 %v378_v55, %s1733_s10  ;;  %399 = vst.msk [vmem:[#allocation3 + $0x28] sm:$0xff] %vm343_vm0, %v1882_v59  ;;  %v1889_v60 = vld [vmem:[#allocation2 + $0x60] sm:$0xff]  ;;  %v433_v26 = vsel %vm418_vm2, %v431_v23, %v432_v24  ;;  %v434_v32 = vrot.slane %v1882_v59, 1  ;;  %v435_v33 = vrot.slane %v385_v28, 1  ;;  %v491_v39 = vsel %vm476_vm3, %v489_v37, %v490_v38  ;;  %v387_v43 = vld [vmem:[#allocation2 + $0x68] sm:$0x3] }
  0x97   : > { %400 = vst.msk [vmem:[#allocation3 + $0x30] sm:$0xff] %vm343_vm0, %v1889_v60  ;;  %v502_v61 = vpop.permute.xlu0 %501  ;;  %1652 = vmatprep.subr.mxu0 %v758_v31  ;;  %v492_v40 = vrot.slane %v1882_v59, 2  ;;  %v493_v41 = vrot.slane %v385_v28, 2  ;;  %v437_v44 = vrot.slane %v1889_v60, 1  ;;  %v438_v45 = vrot.slane %v387_v43, 1 }
  0x98   : > { %526 = vst.msk [vmem:[#allocation3] sm:$0xff] %vm525_vm5, %v502_v61  ;;  %1653 = vmatpush3.msra.mxu0 %v758_v31  ;;  %v436_v36 = vsel %vm418_vm2, %v434_v32, %v435_v33  ;;  %v496_v52 = vrot.slane %v387_v43, 2  ;;  %v1999_v61 = vpop.permute.xlu1 %656 }
  0x99   : > { %v1894_v62 = vld [vmem:[#allocation2 + $0x70] sm:$0xff]  ;;  %1654 = vmatprep.subr.mxu0 %v757_v34  ;;  %v494_v42 = vsel %vm476_vm3, %v492_v40, %v493_v41  ;;  %v439_v46 = vsel %vm418_vm2, %v437_v44, %v438_v45  ;;  %v389_v47 = vld [vmem:[#allocation2 + $0x78] sm:$0x3] }
  0x9a   : > { %539 = vrot.lane.b32.xlu1 %v1866_v51, %s1736_s13  ;;  %648 = vrot.lane.b32.xlu0 %v1882_v59, %s1733_s10  ;;  %401 = vst.msk [vmem:[#allocation3 + $0x38] sm:$0xff] %vm343_vm0, %v1894_v62  ;;  %v1910_v63 = vld [vmem:[#allocation2 + $0x80] sm:$0xff]  ;;  %v440_v48 = vrot.slane %v1894_v62, 1  ;;  %v441_v49 = vrot.slane %v389_v47, 1  ;;  %v495_v51 = vrot.slane %v1889_v60, 2  ;;  %v498_v54 = vrot.slane %v1894_v62, 2 }
  0x9b   : > { %1655 = vmatpush3.msra.mxu0 %v757_v34  ;;  %v499_v55 = vrot.slane %v389_v47, 2  ;;  %v569_v58 = vrot.slane %v1910_v63, 1  ;;  %vm1056_vm0 = vcmask 130112  }
  0x9c   : > { %1656 = vmatprep.subr.mxu0 %v756_v35  ;;  %v442_v50 = vsel %vm418_vm2, %v440_v48, %v441_v49  ;;  %v497_v53 = vsel %vm476_vm3, %v495_v51, %v496_v52  ;;  %v2006_v2 = vpop.permute.xlu1 %693 }
  0x9d   : > { %1657 = vmatpush3.msra.mxu0 %v756_v35  ;;  %v500_v56 = vsel %vm476_vm3, %v498_v54, %v499_v55 }
  0x9e   : > { %646 = vrot.lane.b32.xlu1 %v1875_v57, %s1733_s10  ;;  %545 = vrot.lane.b32.xlu0 %v1889_v60, %s1736_s13  ;;  %v391_v57 = vld [vmem:[#allocation2 + $0x88] sm:$0x3] }
  0x9f   : > { %v606_v1 = vrot.slane %v391_v57, 2 }
  0xa2   : > { %543 = vrot.lane.b32.xlu1 %v1882_v59, %s1736_s13  ;;  %652 = vrot.lane.b32.xlu0 %v1894_v62, %s1733_s10  ;;  %v570_v59 = vrot.slane %v391_v57, 1 }
  0xa6   : > { %650 = vrot.lane.b32.xlu1 %v1889_v60, %s1733_s10  ;;  %549 = vrot.lane.b32.xlu0 %v1910_v63, %s1736_s13  ;;  %v571_v60 = vsel %vm418_vm2, %v569_v58, %v570_v59 }
  0xaa   : > { %654 = vrot.lane.b32.xlu0 %v1910_v63, %s1733_s10  ;;  %547 = vrot.lane.b32.xlu1 %v1894_v62, %s1736_s13  ;;  %v605_v62 = vrot.slane %v1910_v63, 2  ;;  %v714_v63 = vsel %vm476_vm3, %v712_v3, %v713_v4 }
  0xae   : > { %572 = vrot.lane.b32.xlu0 %v424_v6, %s1737_s14  ;;  %445 = vrot.lane.b32.xlu1 %v424_v6, %s1732_s9  ;;  %v607_v6 = vsel %vm476_vm3, %v605_v62, %v606_v1 }
  0xb2   : > { %574 = vrot.lane.b32.xlu0 %v427_v11, %s1737_s14  ;;  %503 = vrot.lane.b32.xlu1 %v482_v12, %s1734_s11 }
  0xb6   : > { %449 = vrot.lane.b32.xlu0 %v430_v15, %s1732_s9  ;;  %447 = vrot.lane.b32.xlu1 %v427_v11, %s1732_s9 }
  0xba   : > { %610 = vrot.lane.b32.xlu0 %v485_v18, %s1738_s15  ;;  %608 = vrot.lane.b32.xlu1 %v482_v12, %s1738_s15 }
  0xbe   : > { %507 = vrot.lane.b32.xlu0 %v488_v21, %s1734_s11  ;;  %505 = vrot.lane.b32.xlu1 %v485_v18, %s1734_s11 }
  0xc2   : > { %681 = vrot.lane.b32.xlu0 %v430_v15, %s1735_s12  ;;  %679 = vrot.lane.b32.xlu1 %v427_v11, %s1735_s12 }
  0xc6   : > { %451 = vrot.lane.b32.xlu0 %v433_v26, %s1732_s9  ;;  %576 = vrot.lane.b32.xlu1 %v430_v15, %s1737_s14 }
  0xca   : > { %612 = vrot.lane.b32.xlu0 %v488_v21, %s1738_s15  ;;  %715 = vrot.lane.b32.xlu1 %v485_v18, %s1739_s26 }
  0xce   : > { %453 = vrot.lane.b32.xlu0 %v436_v36, %s1732_s9  ;;  %578 = vrot.lane.b32.xlu1 %v433_v26, %s1737_s14 }
  0xd2   : > { %614 = vrot.lane.b32.xlu0 %v491_v39, %s1738_s15  ;;  %717 = vrot.lane.b32.xlu1 %v488_v21, %s1739_s26 }
  0xd6   : > { %511 = vrot.lane.b32.xlu0 %v494_v42, %s1734_s11  ;;  %509 = vrot.lane.b32.xlu1 %v491_v39, %s1734_s11 }
  0xda   : > { %685 = vrot.lane.b32.xlu0 %v436_v36, %s1735_s12  ;;  %683 = vrot.lane.b32.xlu1 %v433_v26, %s1735_s12 }
  0xde   : > { %455 = vrot.lane.b32.xlu0 %v439_v46, %s1732_s9  ;;  %580 = vrot.lane.b32.xlu1 %v436_v36, %s1737_s14 }
  0xe2   : > { %616 = vrot.lane.b32.xlu0 %v494_v42, %s1738_s15  ;;  %719 = vrot.lane.b32.xlu1 %v491_v39, %s1739_s26 }
  0xe6   : > { %582 = vrot.lane.b32.xlu1 %v439_v46, %s1737_s14  ;;  %457 = vrot.lane.b32.xlu0 %v442_v50, %s1732_s9 }
  0xea   : > { %721 = vrot.lane.b32.xlu1 %v494_v42, %s1739_s26  ;;  %618 = vrot.lane.b32.xlu0 %v497_v53, %s1738_s15 }
  0xee   : > { %513 = vrot.lane.b32.xlu1 %v497_v53, %s1734_s11  ;;  %515 = vrot.lane.b32.xlu0 %v500_v56, %s1734_s11 }
  0xf2   : > { %687 = vrot.lane.b32.xlu1 %v439_v46, %s1735_s12  ;;  %689 = vrot.lane.b32.xlu0 %v442_v50, %s1735_s12 }
  0xf6   : > { %584 = vrot.lane.b32.xlu1 %v442_v50, %s1737_s14  ;;  %586 = vrot.lane.b32.xlu0 %v571_v60, %s1737_s14 }
  0xfa   : > { %723 = vrot.lane.b32.xlu1 %v497_v53, %s1739_s26  ;;  %725 = vrot.lane.b32.xlu0 %v500_v56, %s1739_s26 }
  0xfe   : > { %620 = vrot.lane.b32.xlu1 %v500_v56, %s1738_s15  ;;  %691 = vrot.lane.b32.xlu0 %v571_v60, %s1735_s12 }
 0x100   : > { %v536_v5 = vpop.permute.xlu0 %535 }
 0x101   : > { %560 = vst.msk [vmem:[#allocation3] sm:$0xff] %vm559_vm7, %v536_v5 }
 0x102   : > { %622 = vrot.lane.b32.xlu1 %v607_v6, %s1738_s15  ;;  %727 = vrot.lane.b32.xlu0 %v607_v6, %s1739_s26  ;;  %s1742_s15 = smov 40  }
 0x104   : > { %v538_v7 = vpop.permute.xlu1 %537  ;;  %v645_v8 = vpop.permute.xlu0 %644 }
 0x106   : > { %729 = vrot.lane.b32.xlu1 %v714_v63, %s1739_s26 }
 0x108   : > { %v643_v9 = vpop.permute.xlu1 %642  ;;  %v542_v10 = vpop.permute.xlu0 %541 }
 0x10c   : > { %v540_v29 = vpop.permute.xlu1 %539  ;;  %v2016_v11 = vpop.permute.xlu0 %648 }
 0x110   : > { %v647_v30 = vpop.permute.xlu1 %646  ;;  %v2018_v12 = vpop.permute.xlu0 %545 }
 0x114   : > { %v2020_v13 = vpop.permute.xlu1 %543  ;;  %v2022_v14 = vpop.permute.xlu0 %652 }
 0x118   : > { %v2024_v15 = vpop.permute.xlu1 %650  ;;  %v2026_v16 = vpop.permute.xlu0 %549 }
 0x11c   : > { %v2028_v17 = vpop.permute.xlu1 %547  ;;  %v2030_v18 = vpop.permute.xlu0 %654 }
 0x120   : > { %v446_v19 = vpop.permute.xlu1 %445  ;;  %v573_v20 = vpop.permute.xlu0 %572 }
 0x121   : > { %469 = vst.msk [vmem:[#allocation3 + $0x8] sm:$0xff] %vm467_vm4, %v446_v19 }
 0x122   : > { %597 = vst.msk [vmem:[#allocation3] sm:$0xff] %vm596_vm8, %v573_v20 }
 0x124   : > { %v504_v21 = vpop.permute.xlu1 %503  ;;  %v575_v22 = vpop.permute.xlu0 %574 }
 0x125   : > { %527 = vst.msk [vmem:[#allocation3 + $0x8] sm:$0xff] %vm525_vm5, %v504_v21 }
 0x126   : > { %561 = vst.msk [vmem:[#allocation3 + $0x8] sm:$0xff] %vm559_vm7, %v538_v7 }
 0x127   : > { %598 = vst.msk [vmem:[#allocation3 + $0x8] sm:$0xff] %vm596_vm8, %v575_v22  ;;  %v2170_v22 = vld [vmem:[%s2452_s2] ss:$0 sm:$0xff] }
 0x128   : > { %v448_v23 = vpop.permute.xlu1 %447  ;;  %v450_v24 = vpop.permute.xlu0 %449 }
 0x129   : > { %470 = vst.msk [vmem:[#allocation3 + $0x10] sm:$0xff] %vm467_vm4, %v448_v23  ;;  %471 = vst.msk [vmem:[#allocation3 + $0x18] sm:$0xff] %vm467_vm4, %v450_v24  ;;  %v2175_v24 = vld [vmem:[%s2453_s3] ss:$0 sm:$0xff] }
 0x12c   : > { %v609_v25 = vpop.permute.xlu1 %608  ;;  %v611_v26 = vpop.permute.xlu0 %610 }
 0x12d   : > { %633 = vst.msk [vmem:[#allocation3] sm:$0xff] %vm632_vm9, %v609_v25  ;;  %634 = vst.msk [vmem:[#allocation3 + $0x8] sm:$0xff] %vm632_vm9, %v611_v26 }
 0x12e   : > { %667 = vst.msk [vmem:[#allocation3] sm:$0xff] %vm666_vm10, %v643_v9  ;;  %668 = vst.msk [vmem:[#allocation3 + $0x8] sm:$0xff] %vm666_vm10, %v645_v8 }
 0x130   : > { %v506_v27 = vpop.permute.xlu1 %505  ;;  %v508_v28 = vpop.permute.xlu0 %507 }
 0x131   : > { %528 = vst.msk [vmem:[#allocation3 + $0x10] sm:$0xff] %vm525_vm5, %v506_v27  ;;  %529 = vst.msk [vmem:[#allocation3 + $0x18] sm:$0xff] %vm525_vm5, %v508_v28 }
 0x132   : > { %562 = vst.msk [vmem:[#allocation3 + $0x10] sm:$0xff] %vm559_vm7, %v540_v29  ;;  %563 = vst.msk [vmem:[#allocation3 + $0x18] sm:$0xff] %vm559_vm7, %v542_v10 }
 0x134   : > { %v680_v31 = vpop.permute.xlu1 %679  ;;  %v682_v32 = vpop.permute.xlu0 %681 }
 0x135   : > { %704 = vst.msk [vmem:[#allocation3] sm:$0xff] %vm703_vm11, %v680_v31  ;;  %705 = vst.msk [vmem:[#allocation3 + $0x8] sm:$0xff] %vm703_vm11, %v682_v32 }
 0x138   : > { %v577_v33 = vpop.permute.xlu1 %576  ;;  %v452_v34 = vpop.permute.xlu0 %451 }
 0x139   : > { %599 = vst.msk [vmem:[#allocation3 + $0x10] sm:$0xff] %vm596_vm8, %v577_v33 }
 0x13a   : > { %472 = vst.msk [vmem:[#allocation3 + $0x20] sm:$0xff] %vm467_vm4, %v452_v34 }
 0x13c   : > { %v716_v35 = vpop.permute.xlu1 %715  ;;  %v613_v36 = vpop.permute.xlu0 %612 }
 0x13d   : > { %740 = vst.msk [vmem:[#allocation3] sm:$0xff] %vm739_vm12, %v716_v35 }
 0x13e   : > { %635 = vst.msk [vmem:[#allocation3 + $0x10] sm:$0xff] %vm632_vm9, %v613_v36 }
 0x13f   : > { %669 = vst.msk [vmem:[#allocation3 + $0x10] sm:$0xff] %vm666_vm10, %v647_v30  ;;  %v2151_v30 = vld [vmem:[#allocation4 + $0x90] sm:$0xff] }
 0x140   : > { %v579_v37 = vpop.permute.xlu1 %578  ;;  %v454_v38 = vpop.permute.xlu0 %453  ;;  %1244 = vrot.lane.b32.xlu1 %v2151_v30, %s1740_s29 }
 0x141   : > { %600 = vst.msk [vmem:[#allocation3 + $0x18] sm:$0xff] %vm596_vm8, %v579_v37 }
 0x142   : > { %473 = vst.msk [vmem:[#allocation3 + $0x28] sm:$0xff] %vm467_vm4, %v454_v38 }
 0x144   : > { %v718_v39 = vpop.permute.xlu1 %717  ;;  %v615_v40 = vpop.permute.xlu0 %614  ;;  %v748_v41 = vld [vmem:[#allocation3] sm:$0xff] }
 0x145   : > { %741 = vst.msk [vmem:[#allocation3 + $0x8] sm:$0xff] %vm739_vm12, %v718_v39  ;;  %1658 = vmatprep.mubr.msk.f32.mxu0 %vm761_vm13, %v748_v41 }
 0x146   : > { %636 = vst.msk [vmem:[#allocation3 + $0x18] sm:$0xff] %vm632_vm9, %v615_v40 }
 0x147   : > { %670 = vst.msk [vmem:[#allocation3 + $0x18] sm:$0xff] %vm666_vm10, %v2016_v11 }
 0x148   : > { %v510_v42 = vpop.permute.xlu1 %509  ;;  %v512_v43 = vpop.permute.xlu0 %511 }
 0x149   : > { %530 = vst.msk [vmem:[#allocation3 + $0x20] sm:$0xff] %vm525_vm5, %v510_v42  ;;  %531 = vst.msk [vmem:[#allocation3 + $0x28] sm:$0xff] %vm525_vm5, %v512_v43 }
 0x14a   : > { %564 = vst.msk [vmem:[#allocation3 + $0x20] sm:$0xff] %vm559_vm7, %v2020_v13  ;;  %565 = vst.msk [vmem:[#allocation3 + $0x28] sm:$0xff] %vm559_vm7, %v2018_v12 }
 0x14c   : > { %v684_v44 = vpop.permute.xlu1 %683  ;;  %v686_v45 = vpop.permute.xlu0 %685  ;;  %v749_v46 = vld [vmem:[#allocation3 + $0x8] sm:$0xff] }
 0x14d   : > { %706 = vst.msk [vmem:[#allocation3 + $0x10] sm:$0xff] %vm703_vm11, %v684_v44  ;;  %707 = vst.msk [vmem:[#allocation3 + $0x18] sm:$0xff] %vm703_vm11, %v686_v45  ;;  %1659 = vmatmul.mubr.msk.f32.vlgmr.msra.gmra.mxu0 %vm761_vm13, %v749_v46 }
 0x150   : > { %v581_v47 = vpop.permute.xlu1 %580  ;;  %v456_v48 = vpop.permute.xlu0 %455 }
 0x151   : > { %601 = vst.msk [vmem:[#allocation3 + $0x20] sm:$0xff] %vm596_vm8, %v581_v47 }
 0x152   : > { %474 = vst.msk [vmem:[#allocation3 + $0x30] sm:$0xff] %vm467_vm4, %v456_v48 }
 0x154   : > { %v720_v49 = vpop.permute.xlu1 %719  ;;  %v617_v50 = vpop.permute.xlu0 %616 }
 0x155   : > { %742 = vst.msk [vmem:[#allocation3 + $0x10] sm:$0xff] %vm739_vm12, %v720_v49 }
 0x156   : > { %637 = vst.msk [vmem:[#allocation3 + $0x20] sm:$0xff] %vm632_vm9, %v617_v50 }
 0x157   : > { %671 = vst.msk [vmem:[#allocation3 + $0x20] sm:$0xff] %vm666_vm10, %v2024_v15  ;;  %v1264_v15 = vrot.slane %v2151_v30, 1 }
 0x158   : > { %v583_v51 = vpop.permute.xlu1 %582  ;;  %v458_v52 = vpop.permute.xlu0 %457 }
 0x159   : > { %602 = vst.msk [vmem:[#allocation3 + $0x28] sm:$0xff] %vm596_vm8, %v583_v51 }
 0x15a   : > { %475 = vst.msk [vmem:[#allocation3 + $0x38] sm:$0xff] %vm467_vm4, %v458_v52  ;;  %vm1220_vm4 = vcmask 392512  }
 0x15c   : > { %v722_v53 = vpop.permute.xlu1 %721  ;;  %v619_v54 = vpop.permute.xlu0 %618  ;;  %v750_v55 = vld [vmem:[#allocation3 + $0x10] sm:$0xff] }
 0x15d   : > { %743 = vst.msk [vmem:[#allocation3 + $0x18] sm:$0xff] %vm739_vm12, %v722_v53  ;;  %1661 = vmatprep.mubr.msk.f32.mxu0 %vm761_vm13, %v750_v55 }
 0x15e   : > { %638 = vst.msk [vmem:[#allocation3 + $0x28] sm:$0xff] %vm632_vm9, %v619_v54 }
 0x15f   : > { %672 = vst.msk [vmem:[#allocation3 + $0x28] sm:$0xff] %vm666_vm10, %v2022_v14  ;;  %v2156_v14 = vld [vmem:[#allocation4 + $0x98] sm:$0x3] }
 0x160   : > { %v514_v56 = vpop.permute.xlu1 %513  ;;  %v516_v57 = vpop.permute.xlu0 %515  ;;  %v1265_v0 = vrot.slane %v2156_v14, 1 }
 0x161   : > { %532 = vst.msk [vmem:[#allocation3 + $0x30] sm:$0xff] %vm525_vm5, %v514_v56  ;;  %533 = vst.msk [vmem:[#allocation3 + $0x38] sm:$0xff] %vm525_vm5, %v516_v57  ;;  %vm1254_vm5 = vcmask 458112  }
 0x162   : > { %566 = vst.msk [vmem:[#allocation3 + $0x30] sm:$0xff] %vm559_vm7, %v2028_v17  ;;  %567 = vst.msk [vmem:[#allocation3 + $0x38] sm:$0xff] %vm559_vm7, %v2026_v16  ;;  %v1266_v19 = vsel %vm418_vm2, %v1264_v15, %v1265_v0  ;;  %vm1327_vm7 = vcmask 589312  }
 0x163   : > { %1281 = vrot.lane.b32.xlu1 %v1266_v19, %s1741_s30 }
 0x164   : > { %v688_v58 = vpop.permute.xlu1 %687  ;;  %v690_v59 = vpop.permute.xlu0 %689  ;;  %v751_v60 = vld [vmem:[#allocation3 + $0x18] sm:$0xff] }
 0x165   : > { %708 = vst.msk [vmem:[#allocation3 + $0x20] sm:$0xff] %vm703_vm11, %v688_v58  ;;  %709 = vst.msk [vmem:[#allocation3 + $0x28] sm:$0xff] %vm703_vm11, %v690_v59  ;;  %1662 = vmatmul.mubr.msk.f32.gmra.mxu0 %vm761_vm13, %v751_v60 }
 0x168   : > { %v585_v62 = vpop.permute.xlu1 %584  ;;  %v587_v1 = vpop.permute.xlu0 %586 }
 0x169   : > { %603 = vst.msk [vmem:[#allocation3 + $0x30] sm:$0xff] %vm596_vm8, %v585_v62  ;;  %604 = vst.msk [vmem:[#allocation3 + $0x38] sm:$0xff] %vm596_vm8, %v587_v1  ;;  %vm1353_vm8 = vcmask 588800  }
 0x16c   : > { %v724_v3 = vpop.permute.xlu1 %723  ;;  %v726_v4 = vpop.permute.xlu0 %725 }
 0x16d   : > { %744 = vst.msk [vmem:[#allocation3 + $0x20] sm:$0xff] %vm739_vm12, %v724_v3  ;;  %745 = vst.msk [vmem:[#allocation3 + $0x28] sm:$0xff] %vm739_vm12, %v726_v4 }
 0x170   : > { %v621_v5 = vpop.permute.xlu1 %620  ;;  %v692_v6 = vpop.permute.xlu0 %691 }
 0x171   : > { %639 = vst.msk [vmem:[#allocation3 + $0x30] sm:$0xff] %vm632_vm9, %v621_v5 }
 0x172   : > { %673 = vst.msk [vmem:[#allocation3 + $0x30] sm:$0xff] %vm666_vm10, %v2030_v18 }
 0x173   : > { %710 = vst.msk [vmem:[#allocation3 + $0x30] sm:$0xff] %vm703_vm11, %v692_v6 }
 0x174   : > { %v623_v63 = vpop.permute.xlu1 %622  ;;  %v728_v7 = vpop.permute.xlu0 %727  ;;  %v752_v8 = vld [vmem:[#allocation3 + $0x20] sm:$0xff]  ;;  %v753_v9 = vld [vmem:[#allocation3 + $0x28] sm:$0xff] }
 0x175   : > { %640 = vst.msk [vmem:[#allocation3 + $0x38] sm:$0xff] %vm632_vm9, %v623_v63  ;;  %1664 = vmatprep.mubr.msk.f32.mxu0 %vm761_vm13, %v752_v8 }
 0x176   : > { %746 = vst.msk [vmem:[#allocation3 + $0x30] sm:$0xff] %vm739_vm12, %v728_v7  ;;  %1665 = vmatmul.mubr.msk.f32.gmra.mxu0 %vm761_vm13, %v753_v9 }
 0x177   : > { %674 = vst.msk [vmem:[#allocation3 + $0x38] sm:$0xff] %vm666_vm10, %v1999_v61  ;;  %v964_v61 = vld [vmem:[#allocation4] sm:$0xff] }
 0x178   : > { %711 = vst.msk [vmem:[#allocation3 + $0x38] sm:$0xff] %vm703_vm11, %v2006_v2  ;;  %v730_v10 = vpop.permute.xlu1 %729  ;;  %v965_v2 = vld [vmem:[#allocation4 + $0x8] sm:$0x3]  ;;  %v1008_v12 = vrot.slane %v964_v61, 1  ;;  %v1065_v17 = vrot.slane %v964_v61, 2 }
 0x179   : > { %747 = vst.msk [vmem:[#allocation3 + $0x38] sm:$0xff] %vm739_vm12, %v730_v10  ;;  %v1009_v13 = vrot.slane %v965_v2, 1  ;;  %v1066_v18 = vrot.slane %v965_v2, 2 }
 0x17a   : > { %984 = vst.msk [vmem:[#allocation5] sm:$0xff] %vm933_vm14, %v964_v61 }
 0x17b   : > { %v1010_v16 = vsel %vm418_vm2, %v1008_v12, %v1009_v13  ;;  %v1067_v20 = vsel %vm476_vm3, %v1065_v17, %v1066_v18 }
 0x17c   : > { %1032 = vrot.lane.b32.xlu0 %v1010_v16, %s1734_s11 }
 0x17d   : > { %v754_v29 = vld [vmem:[#allocation3 + $0x30] sm:$0xff] }
 0x17e   : > { %1667 = vmatprep.mubr.msk.f32.mxu0 %vm761_vm13, %v754_v29 }
 0x180   : > { %v755_v11 = vld [vmem:[#allocation3 + $0x38] sm:$0xff]  ;;  %1089 = vrot.lane.b32.xlu0 %v1067_v20, %s1737_s14 }
 0x181   : > { %1668 = vmatmul.mubr.msk.f32.gmra.mxu0 %vm761_vm13, %v755_v11 }
 0x1ee   : > { %v1033_v21 = vpop.permute.xlu0 %1032 }
 0x1ef   : > { %1057 = vst.msk [vmem:[#allocation5] sm:$0xff] %vm1056_vm0, %v1033_v21 }
 0x1f2   : > { %v1090_v25 = vpop.permute.xlu0 %1089 }
 0x1f3   : > { %1114 = vst.msk [vmem:[#allocation5] sm:$0xff] %vm1113_vm1, %v1090_v25 }
 0x20d   : > { %v1660_v23 = vpop.f32.mrf.mxu0 }
 0x20e   : > { %v903_v26 = vmul.f32 %v1660_v23, %v2170_v22 }
 0x20f   : > { %v856_v27 = vpop.f32.mrf.mxu0 }
 0x210   : > { %v918_v28 = vadd.f32 %v2175_v24, %v903_v26  ;;  %v902_v31 = vmul.f32 %v2170_v22, %v856_v27  ;;  %v1352_v26 = vld [vmem:[%s2454_s4 + $0x40] sm:$0xff] }
 0x211   : > { %1670 = vmatprep.subr.mxu1 %v1352_v26 }
 0x212   : > { %v926_v32 = vmax.f32 %v918_v28, 0.0  ;;  %v917_v33 = vadd.f32 %v2175_v24, %v902_v31  ;;  %1671 = vmatpush3.msra.mxu1 %v1352_v26 }
 0x214   : > { %957 = vst.msk [vmem:[#allocation4 + $0x21] sm:$0xff] %vm933_vm14, %v926_v32  ;;  %v925_v34 = vmax.f32 %v917_v33, 0.0  ;;  %v1350_v32 = vld [vmem:[%s2454_s4 + $0x30] sm:$0xff] }
 0x216   : > { %956 = vst.msk [vmem:[#allocation4 + $0x11] sm:$0xff] %vm933_vm14, %v925_v34  ;;  %v1349_v34 = vld [vmem:[%s2454_s4 + $0x28] sm:$0xff] }
 0x21b   : > { %v968_v35 = vld [vmem:[#allocation4 + $0x20] sm:$0xff]  ;;  %v969_v36 = vld [vmem:[#allocation4 + $0x28] sm:$0x3] }
 0x21c   : > { %1125 = vrot.lane.b32.xlu1 %v968_v35, %s1733_s10  ;;  %986 = vst.msk [vmem:[#allocation5 + $0x10] sm:$0xff] %vm933_vm14, %v968_v35  ;;  %v1014_v38 = vrot.slane %v968_v35, 1  ;;  %v1015_v39 = vrot.slane %v969_v36, 1  ;;  %v1071_v41 = vrot.slane %v968_v35, 2  ;;  %v1072_v42 = vrot.slane %v969_v36, 2  ;;  %v1348_v36 = vld [vmem:[%s2454_s4 + $0x20] sm:$0xff] }
 0x21d   : > { %v966_v37 = vld [vmem:[#allocation4 + $0x10] sm:$0xff]  ;;  %v967_v52 = vld [vmem:[#allocation4 + $0x18] sm:$0x3] }
 0x21e   : > { %1123 = vrot.lane.b32.xlu0 %v966_v37, %s1733_s10  ;;  %985 = vst.msk [vmem:[#allocation5 + $0x8] sm:$0xff] %vm933_vm14, %v966_v37  ;;  %v1016_v40 = vsel %vm418_vm2, %v1014_v38, %v1015_v39  ;;  %v1073_v44 = vsel %vm476_vm3, %v1071_v41, %v1072_v42  ;;  %v1011_v54 = vrot.slane %v966_v37, 1  ;;  %v1012_v55 = vrot.slane %v967_v52, 1  ;;  %v1346_v38 = vld [vmem:[%s2454_s4 + $0x10] sm:$0xff] }
 0x21f   : > { %v1068_v58 = vrot.slane %v966_v37, 2  ;;  %v1069_v59 = vrot.slane %v967_v52, 2  ;;  %v1347_v37 = vld [vmem:[%s2454_s4 + $0x18] sm:$0xff] }
 0x220   : > { %1230 = vrot.lane.b32.xlu1 %v968_v35, %s1740_s29  ;;  %v1013_v62 = vsel %vm418_vm2, %v1011_v54, %v1012_v55 }
 0x221   : > { %v1070_v6 = vsel %vm476_vm3, %v1068_v58, %v1069_v59 }
 0x222   : > { %1162 = vrot.lane.b32.xlu0 %v1016_v40, %s1739_s26 }
 0x224   : > { %1036 = vrot.lane.b32.xlu1 %v1016_v40, %s1734_s11 }
 0x225   : > { %v1663_v43 = vpop.f32.mrf.mxu0 }
 0x226   : > { %v905_v45 = vmul.f32 %v1663_v43, %v2170_v22  ;;  %1198 = vrot.lane.b32.xlu0 %v1073_v44, %s1742_s15  ;;  %v1344_v43 = vld [vmem:[%s2454_s4] sm:$0xff] }
 0x227   : > { %v866_v46 = vpop.f32.mrf.mxu0 }
 0x228   : > { %v920_v47 = vadd.f32 %v2175_v24, %v905_v45  ;;  %v904_v48 = vmul.f32 %v2170_v22, %v866_v46  ;;  %1093 = vrot.lane.b32.xlu1 %v1073_v44, %s1737_s14 }
 0x22a   : > { %v928_v49 = vmax.f32 %v920_v47, 0.0  ;;  %v919_v50 = vadd.f32 %v2175_v24, %v904_v48 }
 0x22c   : > { %959 = vst.msk [vmem:[#allocation4 + $0x41] sm:$0xff] %vm933_vm14, %v928_v49  ;;  %v927_v51 = vmax.f32 %v919_v50, 0.0  ;;  %1267 = vrot.lane.b32.xlu1 %v1016_v40, %s1741_s30  ;;  %v1345_v40 = vld [vmem:[%s2454_s4 + $0x8] sm:$0xff] }
 0x22e   : > { %958 = vst.msk [vmem:[#allocation4 + $0x31] sm:$0xff] %vm933_vm14, %v927_v51 }
 0x230   : > { %1303 = vrot.lane.b32.xlu1 %v1073_v44, %s1743_s16 }
 0x233   : > { %v972_v53 = vld [vmem:[#allocation4 + $0x40] sm:$0xff]  ;;  %v973_v3 = vld [vmem:[#allocation4 + $0x48] sm:$0x3] }
 0x234   : > { %1234 = vrot.lane.b32.xlu1 %v972_v53, %s1740_s29  ;;  %988 = vst.msk [vmem:[#allocation5 + $0x20] sm:$0xff] %vm933_vm14, %v972_v53  ;;  %1129 = vrot.lane.b32.xlu0 %v972_v53, %s1733_s10  ;;  %v1020_v8 = vrot.slane %v972_v53, 1  ;;  %v1021_v9 = vrot.slane %v973_v3, 1  ;;  %v1077_v11 = vrot.slane %v972_v53, 2  ;;  %v1078_v61 = vrot.slane %v973_v3, 2 }
 0x235   : > { %v2206_v56 = vld [vmem:[#allocation4 + $0x30] sm:$0xff]  ;;  %v971_v0 = vld [vmem:[#allocation4 + $0x38] sm:$0x3] }
 0x236   : > { %v1666_v57 = vpop.f32.mrf.mxu0  ;;  %987 = vst.msk [vmem:[#allocation5 + $0x18] sm:$0xff] %vm933_vm14, %v2206_v56  ;;  %v1022_v29 = vsel %vm418_vm2, %v1020_v8, %v1021_v9  ;;  %v1079_v13 = vsel %vm476_vm3, %v1077_v11, %v1078_v61  ;;  %v1017_v23 = vrot.slane %v2206_v56, 1  ;;  %v1018_v25 = vrot.slane %v971_v0, 1 }
 0x237   : > { %v907_v60 = vmul.f32 %v1666_v57, %v2170_v22  ;;  %v1074_v28 = vrot.slane %v2206_v56, 2  ;;  %v1075_v31 = vrot.slane %v971_v0, 2 }
 0x238   : > { %1034 = vrot.lane.b32.xlu1 %v1013_v62, %s1734_s11  ;;  %1160 = vrot.lane.b32.xlu0 %v1013_v62, %s1739_s26  ;;  %v876_v1 = vpop.f32.mrf.mxu0  ;;  %v1019_v27 = vsel %vm418_vm2, %v1017_v23, %v1018_v25 }
 0x239   : > { %v922_v4 = vadd.f32 %v2175_v24, %v907_v60  ;;  %v906_v5 = vmul.f32 %v2170_v22, %v876_v1  ;;  %v1076_v33 = vsel %vm476_vm3, %v1074_v28, %v1075_v31  ;;  %v2323_v1 = vpop.permute.xlu1 %1244 }
 0x23b   : > { %v930_v63 = vmax.f32 %v922_v4, 0.0  ;;  %v921_v7 = vadd.f32 %v2175_v24, %v906_v5 }
 0x23c   : > { %1091 = vrot.lane.b32.xlu1 %v1070_v6, %s1737_s14  ;;  %1232 = vrot.lane.b32.xlu0 %v2206_v56, %s1740_s29 }
 0x23d   : > { %961 = vst.msk [vmem:[#allocation4 + $0x61] sm:$0xff] %vm933_vm14, %v930_v63  ;;  %v929_v10 = vmax.f32 %v921_v7, 0.0  ;;  %v2334_v9 = vpop.permute.xlu1 %1281 }
 0x23f   : > { %960 = vst.msk [vmem:[#allocation4 + $0x51] sm:$0xff] %vm933_vm14, %v929_v10  ;;  %v1300_v10 = vrot.slane %v2151_v30, 2 }
 0x240   : > { %1196 = vrot.lane.b32.xlu1 %v1070_v6, %s1742_s15  ;;  %1040 = vrot.lane.b32.xlu0 %v1022_v29, %s1734_s11 }
 0x241   : > { %v1669_v2 = vpop.f32.mrf.mxu0 }
 0x242   : > { %v909_v12 = vmul.f32 %v1669_v2, %v2170_v22 }
 0x243   : > { %v886_v15 = vpop.f32.mrf.mxu0 }
 0x244   : > { %1202 = vrot.lane.b32.xlu0 %v1079_v13, %s1742_s15  ;;  %1127 = vrot.lane.b32.xlu1 %v2206_v56, %s1733_s10  ;;  %v2231_v16 = vld [vmem:[#allocation4 + $0x60] sm:$0xff]  ;;  %v924_v17 = vadd.f32 %v2175_v24, %v909_v12  ;;  %v908_v18 = vmul.f32 %v2170_v22, %v886_v15  ;;  %v977_v39 = vld [vmem:[#allocation4 + $0x68] sm:$0x3] }
 0x245   : > { %990 = vst.msk [vmem:[#allocation5 + $0x30] sm:$0xff] %vm933_vm14, %v2231_v16  ;;  %v1026_v41 = vrot.slane %v2231_v16, 1  ;;  %v1027_v42 = vrot.slane %v977_v39, 1  ;;  %v1083_v45 = vrot.slane %v2231_v16, 2  ;;  %v1084_v46 = vrot.slane %v977_v39, 2 }
 0x246   : > { %v932_v19 = vmax.f32 %v924_v17, 0.0  ;;  %v923_v20 = vadd.f32 %v2175_v24, %v908_v18  ;;  %v2238_v21 = vld [vmem:[#allocation4 + $0x50] sm:$0xff]  ;;  %v1351_v24 = vld [vmem:[%s2454_s4 + $0x38] sm:$0xff] }
 0x247   : > { %989 = vst.msk [vmem:[#allocation5 + $0x28] sm:$0xff] %vm933_vm14, %v2238_v21  ;;  %1672 = vmatprep.subr.mxu1 %v1351_v24  ;;  %v1028_v44 = vsel %vm418_vm2, %v1026_v41, %v1027_v42  ;;  %v1085_v47 = vsel %vm476_vm3, %v1083_v45, %v1084_v46  ;;  %v975_v49 = vld [vmem:[#allocation4 + $0x58] sm:$0x3]  ;;  %v1023_v50 = vrot.slane %v2238_v21, 1  ;;  %v1080_v53 = vrot.slane %v2238_v21, 2 }
 0x248   : > { %1166 = vrot.lane.b32.xlu1 %v1022_v29, %s1739_s26  ;;  %1133 = vrot.lane.b32.xlu0 %v2231_v16, %s1733_s10  ;;  %963 = vst.msk [vmem:[#allocation4 + $0x81] sm:$0xff] %vm933_vm14, %v932_v19  ;;  %v931_v22 = vmax.f32 %v923_v20, 0.0  ;;  %v1024_v51 = vrot.slane %v975_v49, 1  ;;  %v1081_v54 = vrot.slane %v975_v49, 2 }
 0x249   : > { %1673 = vmatpush3.msra.mxu1 %v1351_v24 }
 0x24a   : > { %962 = vst.msk [vmem:[#allocation4 + $0x71] sm:$0xff] %vm933_vm14, %v931_v22  ;;  %1674 = vmatprep.subr.mxu1 %v1350_v32  ;;  %v1025_v52 = vsel %vm418_vm2, %v1023_v50, %v1024_v51  ;;  %v1082_v55 = vsel %vm476_vm3, %v1080_v53, %v1081_v54 }
 0x24b   : > { %1675 = vmatpush3.msra.mxu1 %v1350_v32 }
 0x24c   : > { %1097 = vrot.lane.b32.xlu1 %v1079_v13, %s1737_s14  ;;  %1038 = vrot.lane.b32.xlu0 %v1019_v27, %s1734_s11 }
 0x24d   : > { %1676 = vmatprep.subr.mxu1 %v1349_v34 }
 0x24e   : > { %1677 = vmatpush3.msra.mxu1 %v1349_v34 }
 0x24f   : > { %1678 = vmatprep.subr.mxu1 %v1348_v36  ;;  %v980_v48 = vld [vmem:[#allocation4 + $0x80] sm:$0xff]  ;;  %v981_v56 = vld [vmem:[#allocation4 + $0x88] sm:$0x3] }
 0x250   : > { %1271 = vrot.lane.b32.xlu1 %v1022_v29, %s1741_s30  ;;  %1095 = vrot.lane.b32.xlu0 %v1076_v33, %s1737_s14  ;;  %v1157_v57 = vrot.slane %v980_v48, 1  ;;  %v1193_v58 = vrot.slane %v980_v48, 2  ;;  %v1158_v59 = vrot.slane %v981_v56, 1  ;;  %v1194_v60 = vrot.slane %v981_v56, 2 }
 0x251   : > { %v2267_v35 = vld [vmem:[#allocation4 + $0x70] sm:$0xff]  ;;  %1679 = vmatpush3.msra.mxu1 %v1348_v36  ;;  %v979_v62 = vld [vmem:[#allocation4 + $0x78] sm:$0x3]  ;;  %v1301_v29 = vrot.slane %v2156_v14, 2 }
 0x252   : > { %991 = vst.msk [vmem:[#allocation5 + $0x38] sm:$0xff] %vm933_vm14, %v2267_v35  ;;  %1680 = vmatprep.subr.mxu1 %v1347_v37  ;;  %v1159_v3 = vsel %vm418_vm2, %v1157_v57, %v1158_v59  ;;  %v1195_v4 = vsel %vm476_vm3, %v1193_v58, %v1194_v60  ;;  %v1029_v5 = vrot.slane %v2267_v35, 1  ;;  %v1030_v6 = vrot.slane %v979_v62, 1 }
 0x253   : > { %1681 = vmatpush3.msra.mxu1 %v1347_v37  ;;  %v1086_v7 = vrot.slane %v2267_v35, 2  ;;  %v1087_v8 = vrot.slane %v979_v62, 2  ;;  %v1302_v61 = vsel %vm476_vm3, %v1300_v10, %v1301_v29 }
 0x254   : > { %1307 = vrot.lane.b32.xlu1 %v1079_v13, %s1743_s16  ;;  %1269 = vrot.lane.b32.xlu0 %v1019_v27, %s1741_s30  ;;  %v1031_v63 = vsel %vm418_vm2, %v1029_v5, %v1030_v6  ;;  %vm1147_vm2 = vcmask 261312  }
 0x255   : > { %1682 = vmatprep.subr.mxu1 %v1346_v38  ;;  %v1088_v11 = vsel %vm476_vm3, %v1086_v7, %v1087_v8  ;;  %vm1184_vm3 = vcmask 326912  }
 0x256   : > { %1683 = vmatpush3.msra.mxu1 %v1346_v38 }
 0x257   : > { %1684 = vmatprep.subr.mxu1 %v1345_v40 }
 0x258   : > { %1238 = vrot.lane.b32.xlu1 %v2231_v16, %s1740_s29  ;;  %1200 = vrot.lane.b32.xlu0 %v1076_v33, %s1742_s15 }
 0x259   : > { %1685 = vmatpush3.msra.mxu1 %v1345_v40 }
 0x25a   : > { %1686 = vmatprep.subr.mxu1 %v1344_v43 }
 0x25b   : > { %1687 = vmatpush3.msra.mxu1 %v1344_v43 }
 0x25c   : > { %1164 = vrot.lane.b32.xlu1 %v1019_v27, %s1739_s26  ;;  %1236 = vrot.lane.b32.xlu0 %v2238_v21, %s1740_s29 }
 0x260   : > { %1305 = vrot.lane.b32.xlu1 %v1076_v33, %s1743_s16  ;;  %1044 = vrot.lane.b32.xlu0 %v1028_v44, %s1734_s11 }
 0x264   : > { %1206 = vrot.lane.b32.xlu0 %v1085_v47, %s1742_s15  ;;  %1131 = vrot.lane.b32.xlu1 %v2238_v21, %s1733_s10 }
 0x268   : > { %1170 = vrot.lane.b32.xlu1 %v1028_v44, %s1739_s26  ;;  %1137 = vrot.lane.b32.xlu0 %v980_v48, %s1733_s10 }
 0x26c   : > { %1101 = vrot.lane.b32.xlu1 %v1085_v47, %s1737_s14  ;;  %1242 = vrot.lane.b32.xlu0 %v980_v48, %s1740_s29 }
 0x270   : > { %1275 = vrot.lane.b32.xlu1 %v1028_v44, %s1741_s30  ;;  %1042 = vrot.lane.b32.xlu0 %v1025_v52, %s1734_s11 }
 0x274   : > { %1311 = vrot.lane.b32.xlu1 %v1085_v47, %s1743_s16  ;;  %1099 = vrot.lane.b32.xlu0 %v1082_v55, %s1737_s14 }
 0x278   : > { %1168 = vrot.lane.b32.xlu1 %v1025_v52, %s1739_s26  ;;  %1273 = vrot.lane.b32.xlu0 %v1025_v52, %s1741_s30 }
 0x27c   : > { %1309 = vrot.lane.b32.xlu1 %v1082_v55, %s1743_s16  ;;  %1204 = vrot.lane.b32.xlu0 %v1082_v55, %s1742_s15 }
 0x280   : > { %1240 = vrot.lane.b32.xlu0 %v2267_v35, %s1740_s29  ;;  %1135 = vrot.lane.b32.xlu1 %v2267_v35, %s1733_s10  ;;  %s1617_s29 = sshll.u32 %s2460_s25, 6 }
 0x284   : > { %1174 = vrot.lane.b32.xlu0 %v1159_v3, %s1739_s26  ;;  %1210 = vrot.lane.b32.xlu1 %v1195_v4, %s1742_s15 }
 0x288   : > { %1279 = vrot.lane.b32.xlu0 %v1159_v3, %s1741_s30  ;;  %1172 = vrot.lane.b32.xlu1 %v1031_v63, %s1739_s26 }
 0x28c   : > { %1208 = vrot.lane.b32.xlu1 %v1088_v11, %s1742_s15  ;;  %1046 = vrot.lane.b32.xlu0 %v1031_v63, %s1734_s11 }
 0x28e   : > { %v1126_v2 = vpop.permute.xlu1 %1125 }
 0x290   : > { %1103 = vrot.lane.b32.xlu0 %v1088_v11, %s1737_s14  ;;  %v1124_v12 = vpop.permute.xlu0 %1123  ;;  %1317 = vrot.lane.b32.xlu1 %v1302_v61, %s1743_s16 }
 0x291   : > { %1148 = vst.msk [vmem:[#allocation5] sm:$0xff] %vm1147_vm2, %v1124_v12 }
 0x292   : > { %v1231_v30 = vpop.permute.xlu1 %1230 }
 0x294   : > { %1277 = vrot.lane.b32.xlu0 %v1031_v63, %s1741_s30  ;;  %v1163_v15 = vpop.permute.xlu0 %1162 }
 0x296   : > { %v1037_v14 = vpop.permute.xlu1 %1036 }
 0x297   : > { %1059 = vst.msk [vmem:[#allocation5 + $0x10] sm:$0xff] %vm1056_vm0, %v1037_v14 }
 0x298   : > { %1313 = vrot.lane.b32.xlu0 %v1088_v11, %s1743_s16  ;;  %v1199_v0 = vpop.permute.xlu0 %1198 }
 0x29a   : > { %v1094_v13 = vpop.permute.xlu1 %1093 }
 0x29b   : > { %1116 = vst.msk [vmem:[#allocation5 + $0x10] sm:$0xff] %vm1113_vm1, %v1094_v13 }
 0x29c   : > { %1315 = vrot.lane.b32.xlu0 %v1195_v4, %s1743_s16  ;;  %s2429_s16 = scalar_lea.vmem %s2457_s7, %s1617_s29 }
 0x29e   : > { %v1268_v16 = vpop.permute.xlu1 %1267 }
 0x2a2   : > { %v1304_v17 = vpop.permute.xlu1 %1303 }
 0x2a6   : > { %v1235_v18 = vpop.permute.xlu1 %1234  ;;  %v1130_v19 = vpop.permute.xlu0 %1129 }
 0x2aa   : > { %v1035_v20 = vpop.permute.xlu1 %1034  ;;  %v1161_v21 = vpop.permute.xlu0 %1160 }
 0x2ab   : > { %1058 = vst.msk [vmem:[#allocation5 + $0x8] sm:$0xff] %vm1056_vm0, %v1035_v20 }
 0x2ac   : > { %1185 = vst.msk [vmem:[#allocation5] sm:$0xff] %vm1184_vm3, %v1161_v21 }
 0x2ae   : > { %v1092_v23 = vpop.permute.xlu1 %1091  ;;  %v1233_v25 = vpop.permute.xlu0 %1232 }
 0x2af   : > { %1115 = vst.msk [vmem:[#allocation5 + $0x8] sm:$0xff] %vm1113_vm1, %v1092_v23 }
 0x2b0   : > { %1149 = vst.msk [vmem:[#allocation5 + $0x8] sm:$0xff] %vm1147_vm2, %v1126_v2 }
 0x2b1   : > { %1186 = vst.msk [vmem:[#allocation5 + $0x8] sm:$0xff] %vm1184_vm3, %v1163_v15 }
 0x2b2   : > { %1222 = vst.msk [vmem:[#allocation5 + $0x8] sm:$0xff] %vm1220_vm4, %v1199_v0  ;;  %v1197_v26 = vpop.permute.xlu1 %1196  ;;  %v1041_v22 = vpop.permute.xlu0 %1040 }
 0x2b3   : > { %1256 = vst.msk [vmem:[#allocation5 + $0x8] sm:$0xff] %vm1254_vm5, %v1233_v25 }
 0x2b4   : > { %1221 = vst.msk [vmem:[#allocation5] sm:$0xff] %vm1220_vm4, %v1197_v26 }
 0x2b5   : > { %1061 = vst.msk [vmem:[#allocation5 + $0x20] sm:$0xff] %vm1056_vm0, %v1041_v22 }
 0x2b6   : > { %1255 = vst.msk [vmem:[#allocation5] sm:$0xff] %vm1254_vm5, %v1231_v30  ;;  %v1128_v24 = vpop.permute.xlu1 %1127  ;;  %v1203_v27 = vpop.permute.xlu0 %1202 }
 0x2b7   : > { %1292 = vst.msk [vmem:[#allocation5] sm:$0xff] %vm1291_vm6, %v1268_v16  ;;  %v1613_v16 = vld [vmem:[%s2456_s6] ss:$0 sm:$0xff] }
 0x2b8   : > { %1328 = vst.msk [vmem:[#allocation5] sm:$0xff] %vm1327_vm7, %v1304_v17 }
 0x2b9   : > { %1150 = vst.msk [vmem:[#allocation5 + $0x10] sm:$0xff] %vm1147_vm2, %v1128_v24 }
 0x2ba   : > { %v1167_v28 = vpop.permute.xlu1 %1166  ;;  %v1134_v31 = vpop.permute.xlu0 %1133 }
 0x2be   : > { %v1098_v33 = vpop.permute.xlu1 %1097  ;;  %v1039_v34 = vpop.permute.xlu0 %1038 }
 0x2bf   : > { %v1336_v32 = vld [vmem:[#allocation5] sm:$0xff]  ;;  %1118 = vst.msk [vmem:[#allocation5 + $0x20] sm:$0xff] %vm1113_vm1, %v1098_v33 }
 0x2c0   : > { %1688 = vmatprep.mubr.msk.f32.mxu1 %vm1353_vm8, %v1336_v32  ;;  %1060 = vst.msk [vmem:[#allocation5 + $0x18] sm:$0xff] %vm1056_vm0, %v1039_v34 }
 0x2c2   : > { %v1272_v35 = vpop.permute.xlu1 %1271  ;;  %v1096_v36 = vpop.permute.xlu0 %1095 }
 0x2c3   : > { %1117 = vst.msk [vmem:[#allocation5 + $0x18] sm:$0xff] %vm1113_vm1, %v1096_v36 }
 0x2c4   : > { %1151 = vst.msk [vmem:[#allocation5 + $0x18] sm:$0xff] %vm1147_vm2, %v1130_v19 }
 0x2c5   : > { %1188 = vst.msk [vmem:[#allocation5 + $0x18] sm:$0xff] %vm1184_vm3, %v1167_v28 }
 0x2c6   : > { %v1308_v37 = vpop.permute.xlu1 %1307  ;;  %1224 = vst.msk [vmem:[#allocation5 + $0x18] sm:$0xff] %vm1220_vm4, %v1203_v27  ;;  %v1270_v38 = vpop.permute.xlu0 %1269 }
 0x2c7   : > { %1293 = vst.msk [vmem:[#allocation5 + $0x8] sm:$0xff] %vm1291_vm6, %v1270_v38 }
 0x2ca   : > { %v1239_v39 = vpop.permute.xlu1 %1238  ;;  %v1201_v40 = vpop.permute.xlu0 %1200 }
 0x2ce   : > { %v1165_v41 = vpop.permute.xlu1 %1164  ;;  %v1237_v42 = vpop.permute.xlu0 %1236 }
 0x2cf   : > { %1187 = vst.msk [vmem:[#allocation5 + $0x10] sm:$0xff] %vm1184_vm3, %v1165_v41 }
 0x2d0   : > { %1258 = vst.msk [vmem:[#allocation5 + $0x18] sm:$0xff] %vm1254_vm5, %v1237_v42 }
 0x2d1   : > { %1223 = vst.msk [vmem:[#allocation5 + $0x10] sm:$0xff] %vm1220_vm4, %v1201_v40 }
 0x2d2   : > { %1257 = vst.msk [vmem:[#allocation5 + $0x10] sm:$0xff] %vm1254_vm5, %v1235_v18  ;;  %v1306_v43 = vpop.permute.xlu1 %1305  ;;  %v1045_v44 = vpop.permute.xlu0 %1044 }
 0x2d3   : > { %1294 = vst.msk [vmem:[#allocation5 + $0x10] sm:$0xff] %vm1291_vm6, %v1272_v35 }
 0x2d4   : > { %1330 = vst.msk [vmem:[#allocation5 + $0x10] sm:$0xff] %vm1327_vm7, %v1308_v37  ;;  %1329 = vst.msk [vmem:[#allocation5 + $0x8] sm:$0xff] %vm1327_vm7, %v1306_v43 }
 0x2d5   : > { %1063 = vst.msk [vmem:[#allocation5 + $0x30] sm:$0xff] %vm1056_vm0, %v1045_v44 }
 0x2d6   : > { %v1132_v45 = vpop.permute.xlu1 %1131  ;;  %v1207_v46 = vpop.permute.xlu0 %1206 }
 0x2d7   : > { %1152 = vst.msk [vmem:[#allocation5 + $0x20] sm:$0xff] %vm1147_vm2, %v1132_v45 }
 0x2da   : > { %v1171_v47 = vpop.permute.xlu1 %1170  ;;  %v1138_v48 = vpop.permute.xlu0 %1137 }
 0x2db   : > { %v1337_v49 = vld [vmem:[#allocation5 + $0x8] sm:$0xff]  ;;  %v1338_v50 = vld [vmem:[#allocation5 + $0x10] sm:$0xff] }
 0x2dc   : > { %1689 = vmatmul.mubr.msk.f32.vlgmr.msra.gmra.mxu1 %vm1353_vm8, %v1337_v49 }
 0x2dd   : > { %1691 = vmatprep.mubr.msk.f32.mxu1 %vm1353_vm8, %v1338_v50 }
 0x2de   : > { %v1102_v51 = vpop.permute.xlu1 %1101  ;;  %v1243_v52 = vpop.permute.xlu0 %1242 }
 0x2df   : > { %1120 = vst.msk [vmem:[#allocation5 + $0x30] sm:$0xff] %vm1113_vm1, %v1102_v51 }
 0x2e2   : > { %v1276_v53 = vpop.permute.xlu1 %1275  ;;  %v1043_v54 = vpop.permute.xlu0 %1042 }
 0x2e3   : > { %1062 = vst.msk [vmem:[#allocation5 + $0x28] sm:$0xff] %vm1056_vm0, %v1043_v54 }
 0x2e6   : > { %v1312_v55 = vpop.permute.xlu1 %1311  ;;  %v1100_v56 = vpop.permute.xlu0 %1099 }
 0x2e7   : > { %1119 = vst.msk [vmem:[#allocation5 + $0x28] sm:$0xff] %vm1113_vm1, %v1100_v56 }
 0x2e8   : > { %1153 = vst.msk [vmem:[#allocation5 + $0x28] sm:$0xff] %vm1147_vm2, %v1134_v31 }
 0x2e9   : > { %1190 = vst.msk [vmem:[#allocation5 + $0x28] sm:$0xff] %vm1184_vm3, %v1171_v47 }
 0x2ea   : > { %v1169_v57 = vpop.permute.xlu1 %1168  ;;  %1226 = vst.msk [vmem:[#allocation5 + $0x28] sm:$0xff] %vm1220_vm4, %v1207_v46  ;;  %v1274_v58 = vpop.permute.xlu0 %1273 }
 0x2eb   : > { %1189 = vst.msk [vmem:[#allocation5 + $0x20] sm:$0xff] %vm1184_vm3, %v1169_v57 }
 0x2ec   : > { %1295 = vst.msk [vmem:[#allocation5 + $0x18] sm:$0xff] %vm1291_vm6, %v1274_v58 }
 0x2ee   : > { %v1310_v59 = vpop.permute.xlu1 %1309  ;;  %v1205_v60 = vpop.permute.xlu0 %1204 }
 0x2ef   : > { %1331 = vst.msk [vmem:[#allocation5 + $0x18] sm:$0xff] %vm1327_vm7, %v1310_v59 }
 0x2f0   : > { %1225 = vst.msk [vmem:[#allocation5 + $0x20] sm:$0xff] %vm1220_vm4, %v1205_v60 }
 0x2f1   : > { %1259 = vst.msk [vmem:[#allocation5 + $0x20] sm:$0xff] %vm1254_vm5, %v1239_v39 }
 0x2f2   : > { %1296 = vst.msk [vmem:[#allocation5 + $0x20] sm:$0xff] %vm1291_vm6, %v1276_v53  ;;  %v1136_v62 = vpop.permute.xlu1 %1135  ;;  %v1241_v3 = vpop.permute.xlu0 %1240 }
 0x2f3   : > { %1332 = vst.msk [vmem:[#allocation5 + $0x20] sm:$0xff] %vm1327_vm7, %v1312_v55 }
 0x2f4   : > { %1154 = vst.msk [vmem:[#allocation5 + $0x30] sm:$0xff] %vm1147_vm2, %v1136_v62 }
 0x2f5   : > { %1260 = vst.msk [vmem:[#allocation5 + $0x28] sm:$0xff] %vm1254_vm5, %v1241_v3 }
 0x2f6   : > { %v1211_v4 = vpop.permute.xlu1 %1210  ;;  %v1175_v5 = vpop.permute.xlu0 %1174  ;;  %v1339_v6 = vld [vmem:[#allocation5 + $0x18] sm:$0xff] }
 0x2f7   : > { %1692 = vmatmul.mubr.msk.f32.gmra.mxu1 %vm1353_vm8, %v1339_v6 }
 0x2fa   : > { %v1340_v63 = vld [vmem:[#allocation5 + $0x20] sm:$0xff]  ;;  %v1173_v7 = vpop.permute.xlu1 %1172  ;;  %v1280_v8 = vpop.permute.xlu0 %1279 }
 0x2fb   : > { %1694 = vmatprep.mubr.msk.f32.mxu1 %vm1353_vm8, %v1340_v63  ;;  %1191 = vst.msk [vmem:[#allocation5 + $0x30] sm:$0xff] %vm1184_vm3, %v1173_v7 }
 0x2fe   : > { %v1209_v10 = vpop.permute.xlu1 %1208  ;;  %v1047_v29 = vpop.permute.xlu0 %1046 }
 0x2ff   : > { %1227 = vst.msk [vmem:[#allocation5 + $0x30] sm:$0xff] %vm1220_vm4, %v1209_v10 }
 0x300   : > { %1064 = vst.msk [vmem:[#allocation5 + $0x38] sm:$0xff] %vm1056_vm0, %v1047_v29 }
 0x301   : > { %1261 = vst.msk [vmem:[#allocation5 + $0x30] sm:$0xff] %vm1254_vm5, %v1243_v52 }
 0x302   : > { %1298 = vst.msk [vmem:[#allocation5 + $0x30] sm:$0xff] %vm1291_vm6, %v1280_v8  ;;  %v1104_v11 = vpop.permute.xlu0 %1103  ;;  %v1318_v2 = vpop.permute.xlu1 %1317 }
 0x303   : > { %1121 = vst.msk [vmem:[#allocation5 + $0x38] sm:$0xff] %vm1113_vm1, %v1104_v11 }
 0x304   : > { %1155 = vst.msk [vmem:[#allocation5 + $0x38] sm:$0xff] %vm1147_vm2, %v1138_v48 }
 0x305   : > { %1192 = vst.msk [vmem:[#allocation5 + $0x38] sm:$0xff] %vm1184_vm3, %v1175_v5 }
 0x306   : > { %1228 = vst.msk [vmem:[#allocation5 + $0x38] sm:$0xff] %vm1220_vm4, %v1211_v4  ;;  %v1278_v61 = vpop.permute.xlu0 %1277 }
 0x307   : > { %1297 = vst.msk [vmem:[#allocation5 + $0x28] sm:$0xff] %vm1291_vm6, %v1278_v61 }
 0x308   : > { %1262 = vst.msk [vmem:[#allocation5 + $0x38] sm:$0xff] %vm1254_vm5, %v2323_v1  ;;  %v1612_v1 = vld [vmem:[%s2455_s5] ss:$0 sm:$0xff] }
 0x309   : > { %1299 = vst.msk [vmem:[#allocation5 + $0x38] sm:$0xff] %vm1291_vm6, %v2334_v9 }
 0x30a   : > { %1335 = vst.msk [vmem:[#allocation5 + $0x38] sm:$0xff] %vm1327_vm7, %v1318_v2  ;;  %v1314_v12 = vpop.permute.xlu0 %1313 }
 0x30b   : > { %1333 = vst.msk [vmem:[#allocation5 + $0x28] sm:$0xff] %vm1327_vm7, %v1314_v12 }
 0x30e   : > { %v1316_v30 = vpop.permute.xlu0 %1315 }
 0x30f   : > { %1334 = vst.msk [vmem:[#allocation5 + $0x30] sm:$0xff] %vm1327_vm7, %v1316_v30 }
 0x311   : > { %v1343_v13 = vld [vmem:[#allocation5 + $0x38] sm:$0xff] }
 0x312   : > { %v1341_v14 = vld [vmem:[#allocation5 + $0x28] sm:$0xff] }
 0x313   : > { %1695 = vmatmul.mubr.msk.f32.gmra.mxu1 %vm1353_vm8, %v1341_v14 }
 0x316   : > { %v1342_v15 = vld [vmem:[#allocation5 + $0x30] sm:$0xff] }
 0x317   : > { %1697 = vmatprep.mubr.msk.f32.mxu1 %vm1353_vm8, %v1342_v15 }
 0x318   : > { %1698 = vmatmul.mubr.msk.f32.gmra.mxu1 %vm1353_vm8, %v1343_v13 }
 0x39c   : > { %v1690_v9 = vpop.f32.mrf.mxu1 }
 0x39d   : > { %v1491_v0 = vmul.f32 %v1690_v9, %v1612_v1 }
 0x39e   : > { %v1444_v17 = vpop.f32.mrf.mxu1 }
 0x39f   : > { %v1506_v18 = vadd.f32 %v1613_v16, %v1491_v0  ;;  %v1490_v19 = vmul.f32 %v1612_v1, %v1444_v17 }
 0x3a1   : > { %v1514_v20 = vmax.f32 %v1506_v18, 0.0  ;;  %v1505_v21 = vadd.f32 %v1613_v16, %v1490_v19 }
 0x3a3   : > { %1522 = vst.msk [vmem:[%s2429_s16 + $0x8] sm:$0xff] %vm933_vm14, %v1514_v20  ;;  %v1513_v23 = vmax.f32 %v1505_v21, 0.0 }
 0x3a5   : > { %1521 = vst.msk [vmem:[%s2429_s16] sm:$0xff] %vm933_vm14, %v1513_v23 }
 0x3b7   : > { %v1693_v25 = vpop.f32.mrf.mxu1 }
 0x3b8   : > { %v1493_v26 = vmul.f32 %v1693_v25, %v1612_v1 }
 0x3b9   : > { %v1454_v22 = vpop.f32.mrf.mxu1 }
 0x3ba   : > { %v1508_v24 = vadd.f32 %v1613_v16, %v1493_v26  ;;  %v1492_v27 = vmul.f32 %v1612_v1, %v1454_v22 }
 0x3bc   : > { %v1516_v28 = vmax.f32 %v1508_v24, 0.0  ;;  %v1507_v31 = vadd.f32 %v1613_v16, %v1492_v27 }
 0x3be   : > { %1524 = vst.msk [vmem:[%s2429_s16 + $0x18] sm:$0xff] %vm933_vm14, %v1516_v28  ;;  %v1515_v32 = vmax.f32 %v1507_v31, 0.0 }
 0x3c0   : > { %1523 = vst.msk [vmem:[%s2429_s16 + $0x10] sm:$0xff] %vm933_vm14, %v1515_v32 }
 0x3d3   : > { %v1696_v33 = vpop.f32.mrf.mxu1 }
 0x3d4   : > { %v1495_v34 = vmul.f32 %v1696_v33, %v1612_v1 }
 0x3d5   : > { %v1464_v35 = vpop.f32.mrf.mxu1 }
 0x3d6   : > { %v1510_v36 = vadd.f32 %v1613_v16, %v1495_v34  ;;  %v1494_v37 = vmul.f32 %v1612_v1, %v1464_v35 }
 0x3d8   : > { %v1518_v38 = vmax.f32 %v1510_v36, 0.0  ;;  %v1509_v39 = vadd.f32 %v1613_v16, %v1494_v37  ;;  %v1699_v40 = vpop.f32.mrf.mxu1 }
 0x3d9   : > { %v1497_v41 = vmul.f32 %v1699_v40, %v1612_v1 }
 0x3da   : > { %1526 = vst.msk [vmem:[%s2429_s16 + $0x28] sm:$0xff] %vm933_vm14, %v1518_v38  ;;  %v1517_v42 = vmax.f32 %v1509_v39, 0.0  ;;  %v1474_v43 = vpop.f32.mrf.mxu1 }
 0x3db   : > { %v1512_v44 = vadd.f32 %v1613_v16, %v1497_v41  ;;  %v1496_v45 = vmul.f32 %v1612_v1, %v1474_v43 }
 0x3dc   : > { %1525 = vst.msk [vmem:[%s2429_s16 + $0x20] sm:$0xff] %vm933_vm14, %v1517_v42 }
 0x3dd   : > { %v1520_v46 = vmax.f32 %v1512_v44, 0.0  ;;  %v1511_v47 = vadd.f32 %v1613_v16, %v1496_v45 }
 0x3df   : > { %1528 = vst.msk [vmem:[%s2429_s16 + $0x38] sm:$0xff] %vm933_vm14, %v1520_v46  ;;  %v1519_v48 = vmax.f32 %v1511_v47, 0.0 }
 0x3e1   : > { %1527 = vst.msk [vmem:[%s2429_s16 + $0x30] sm:$0xff] %vm933_vm14, %v1519_v48 }
 0x3e2 PF: > { %s17_s24 = sadd.s32 1, %s1728_s24  }
 0x3e3   : > { %p14_p4 = scmp.ge.s32.totalorder %s17_s24, 4  }
 0x3e5   :  { %16 = sbr.rel (!%p14_p4) target bundleno = 1 (0x1), region = 80 }

</bundles_post_ra>
